<compile_context>
chip_gen: v7x
topology: tpu7x:2x2x1
jax: 0.10.0
libtpu: 0.0.40
codegen_flags: <defaults>
</compile_context>

<pallas_src>
import functools

import numpy as np
import jax
import jax.numpy as jnp
from jax import lax
from jax.experimental import pallas as pl
from jax.experimental.pallas import tpu as pltpu


# ----------------------------- Pallas kernel -------------------------------

def _gen_res_block_kernel(x_ref, mf_ref,
                          w1_ref, b1_ref, w2_ref, b2_ref,
                          wr_ref, br_ref, wf_ref, bf_ref,
                          mhb_ref, mwc_ref,
                          out_ref, *, img_h, out_img_h):
    """Whole batch in one invocation.  Layouts (channels fused into lanes):

      x_ref  : (B*H,  W*Cin)        bf16
      mf_ref : (B*2H, 2W*Cf)        bf16
      w1_ref : (3*W*Cin,  W*Cout)   bf16  banded conv slab, ky folded into K
      w2_ref : (3*W*Cout, W*Cout)   bf16
      wf_ref : (3*2W*Cf,  2W*Cout)  bf16
      wr_ref : (W*Cin, W*Cout)      bf16  block-diagonal 1x1 residual
      mhb_ref: (B*2H, B*H)          bf16  kron(I_B, Mh) bilinear row operator
      mwc_ref: (W*Cout, 2W*Cout)    bf16  kron(Mw^T, I_C) bilinear col operator
      b*_ref : (1, width*Cout)      f32   lane-tiled biases
      out_ref: (B*2H, 2W*Cout)      f32
    """
    f32 = jnp.float32
    bf16 = jnp.bfloat16

    def lrelu(t):
        return jnp.maximum(t, 0.2 * t)

    def row_masks(n_rows, h):
        # True on the first / last row of every image in the batch-folded stack.
        ridx = lax.broadcasted_iota(jnp.int32, (n_rows, 1), 0)
        return (ridx % h) == 0, (ridx % h) == (h - 1)

    def conv3x3(rows, first, last, w_ref_, b_ref_):
        # rows: (R, K) bf16.  kx taps are folded into the banded weight slab;
        # ky taps are folded into the contraction axis by concatenating the
        # row-shifted copies along lanes -> a single MXU matmul with K=3*K.
        zero = jnp.zeros_like(rows)
        zero_row = jnp.zeros((1, rows.shape[1]), rows.dtype)
        prev_rows = jnp.where(
            first, zero, jnp.concatenate([zero_row, rows[:-1, :]], axis=0))
        next_rows = jnp.where(
            last, zero, jnp.concatenate([rows[1:, :], zero_row], axis=0))
        stacked = jnp.concatenate([prev_rows, rows, next_rows], axis=1)
        return jnp.dot(stacked, w_ref_[...],
                       preferred_element_type=f32) + b_ref_[...]

    x2d = x_ref[...]      # (B*H,  W*Cin)   bf16
    mf2d = mf_ref[...]    # (B*2H, 2W*Cf)   bf16

    first_x, last_x = row_masks(x2d.shape[0], img_h)
    first_f, last_f = row_masks(mf2d.shape[0], out_img_h)

    # ---- main branch: conv3x3 -> lrelu -> conv3x3 -> lrelu ----
    h1 = lrelu(conv3x3(x2d, first_x, last_x, w1_ref, b1_ref))            # (B*H, W*Cout) f32
    h2 = lrelu(conv3x3(h1.astype(bf16), first_x, last_x, w2_ref, b2_ref))

    # ---- residual 1x1 conv (block-diagonal over W) ----
    res = jnp.dot(x2d, wr_ref[...], preferred_element_type=f32) + br_ref[...]
    s = h2 + res                                                          # (B*H, W*Cout)

    # ---- separable bilinear x2 upsample (align_corners=True) ----
    # Width/channel expansion first (still at H rows), then the per-image
    # (block-diagonal) row operator.
    up_w = jnp.dot(s.astype(bf16), mwc_ref[...],
                   preferred_element_type=f32)                            # (B*H, 2W*Cout)
    up = jnp.dot(mhb_ref[...], up_w.astype(bf16),
                 preferred_element_type=f32)                              # (B*2H, 2W*Cout)

    # ---- 3x3 conv on the masked (VGG) features at output resolution ----
    mfc = conv3x3(mf2d, first_f, last_f, wf_ref, bf_ref)                  # (B*2H, 2W*Cout)

    out_ref[...] = up + mfc


# --------------------- Host-side operator packing (glue) --------------------

def _bilinear_matrix_align_corners(n_in: int, n_out: int) -> np.ndarray:
    """Row i gives the bilinear interpolation weights (align_corners=True)."""
    M = np.zeros((n_out, n_in), dtype=np.float32)
    if n_in == 1 or n_out == 1:
        M[:, 0] = 1.0
        return M
    scale = (n_in - 1) / (n_out - 1)
    for i in range(n_out):
        src = i * scale
        i0 = min(int(np.floor(src)), n_in - 1)
        i1 = min(i0 + 1, n_in - 1)
        t = src - i0
        M[i, i0] += 1.0 - t
        M[i, i1] += t
    return M


def _banded_kx_weights(w_hwio: np.ndarray, width: int) -> np.ndarray:
    """(3,3,Cin,Cout) HWIO -> (3*width*Cin, width*Cout): kx taps folded into a
    banded matrix over the fused width*channel lane axis, ky taps folded into
    the contraction axis (stacked as [ky=0; ky=1; ky=2], matching the in-kernel
    lane concatenation [prev, cur, next]).  Out-of-range kx entries are simply
    omitted == zero 'same' padding in W."""
    cin, cout = w_hwio.shape[2], w_hwio.shape[3]
    mat = np.zeros((3, width * cin, width * cout), np.float32)
    for ky in range(3):
        for kx in range(3):
            dx = kx - 1
            for w in range(width):
                src = w + dx
                if 0 <= src < width:
                    mat[ky, src * cin:(src + 1) * cin,
                        w * cout:(w + 1) * cout] = w_hwio[ky, kx]
    return mat.reshape(3 * width * cin, width * cout)


def pack_operators(params, B: int, H: int, W: int):
    """Shape-specialized, deterministic packing of the module parameters into
    kernel-ready operands (done once per (batch, spatial) shape)."""
    OH, OW = 2 * H, 2 * W
    cout = params["b1"].shape[0]
    bf16 = jnp.bfloat16

    Mh = _bilinear_matrix_align_corners(H, OH)    # (OH, H)
    Mw = _bilinear_matrix_align_corners(W, OW)    # (OW, W)

    return {
        "w1": jnp.asarray(_banded_kx_weights(params["w1_hwio"], W), bf16),
        "w2": jnp.asarray(_banded_kx_weights(params["w2_hwio"], W), bf16),
        "wf": jnp.asarray(_banded_kx_weights(params["wf_hwio"], OW), bf16),
        "wr": jnp.asarray(np.kron(np.eye(W, dtype=np.float32),
                                  params["wr_mat"]), bf16),
        "b1": jnp.asarray(np.tile(params["b1"], W)[None, :], jnp.float32),
        "b2": jnp.asarray(np.tile(params["b2"], W)[None, :], jnp.float32),
        "br": jnp.asarray(np.tile(params["br"], W)[None, :], jnp.float32),
        "bf": jnp.asarray(np.tile(params["bf"], OW)[None, :], jnp.float32),
        "mhb": jnp.asarray(np.kron(np.eye(B, dtype=np.float32), Mh), bf16),
        "mwc": jnp.asarray(np.kron(Mw.T, np.eye(cout, dtype=np.float32)), bf16),
    }


# ------------------------------ Host wrapper --------------------------------

def generator_residual_block(x_nchw, feats_nchw, ops):
    """x_nchw: (B, Cin, H, W); feats_nchw: (B, Cf, 2H, 2W).
    Returns (B, Cout, 2H, 2W) NCHW, matching the PyTorch module."""
    B, Cin, H, W = x_nchw.shape
    _, Cf, OH, OW = feats_nchw.shape
    assert OH == 2 * H and OW == 2 * W
    Cout = ops["b1"].shape[1] // W
    assert ops["mhb"].shape == (B * OH, B * H)

    # Batch-folded, lane-dense bf16 activations: (B*rows, width*channels).
    # (The NCHW<->lane-dense transposes are kept only to match the PyTorch
    #  interface; adjacent layers carrying this layout would elide them.)
    x2 = jnp.transpose(x_nchw, (0, 2, 3, 1)).reshape(B * H, W * Cin)
    x2 = x2.astype(jnp.bfloat16)
    mf2 = jnp.transpose(feats_nchw, (0, 2, 3, 1)).reshape(B * OH, OW * Cf)
    mf2 = mf2.astype(jnp.bfloat16)

    kernel = functools.partial(_gen_res_block_kernel, img_h=H, out_img_h=OH)

    vspec = pl.BlockSpec(memory_space=pltpu.MemorySpace.VMEM)
    out_flat = pl.pallas_call(
        kernel,
        out_shape=jax.ShapeDtypeStruct((B * OH, OW * Cout), jnp.float32),
        in_specs=[vspec] * 12,
        out_specs=vspec,
        compiler_params=pltpu.CompilerParams(
            vmem_limit_bytes=32 * 1024 * 1024),   # v7x-safe; residency << 1 MiB
    )(x2, mf2,
      ops["w1"], ops["b1"], ops["w2"], ops["b2"],
      ops["wr"], ops["br"], ops["wf"], ops["bf"],
      ops["mhb"], ops["mwc"])

    out = out_flat.reshape(B, OH, OW, Cout)
    return jnp.transpose(out, (0, 3, 1, 2))        # back to NCHW


# ------------------------- Deterministic parameters -------------------------

def init_params(key, in_channels, out_channels, feature_channels):
    ks = jax.random.split(key, 8)

    def sn_conv(k, co, ci, kh, kw):
        w = 0.1 * np.asarray(jax.random.normal(k, (co, ci, kh, kw), jnp.float32))
        # spectral_norm: divide by the exact largest singular value of (co, ci*kh*kw)
        sigma = np.linalg.svd(w.reshape(co, -1), compute_uv=False)[0]
        return (w / sigma).astype(np.float32)

    w1 = sn_conv(ks[0], out_channels, in_channels, 3, 3)
    w2 = sn_conv(ks[1], out_channels, out_channels, 3, 3)
    wr = sn_conv(ks[2], out_channels, in_channels, 1, 1)
    wf = sn_conv(ks[3], out_channels, feature_channels, 3, 3)
    b1 = 0.1 * np.asarray(jax.random.normal(ks[4], (out_channels,), jnp.float32))
    b2 = 0.1 * np.asarray(jax.random.normal(ks[5], (out_channels,), jnp.float32))
    br = 0.1 * np.asarray(jax.random.normal(ks[6], (out_channels,), jnp.float32))
    bf = 0.1 * np.asarray(jax.random.normal(ks[7], (out_channels,), jnp.float32))

    return {
        # OIHW copies for the reference implementation
        "w1_oihw": jnp.asarray(w1), "w2_oihw": jnp.asarray(w2),
        "wr_oihw": jnp.asarray(wr), "wf_oihw": jnp.asarray(wf),
        # numpy HWIO / matrix forms consumed by pack_operators
        "w1_hwio": np.transpose(w1, (2, 3, 1, 0)),
        "w2_hwio": np.transpose(w2, (2, 3, 1, 0)),
        "wf_hwio": np.transpose(wf, (2, 3, 1, 0)),
        "wr_mat": wr[:, :, 0, 0].T,                 # (Cin, Cout)
        "b1": b1, "b2": b2, "br": br, "bf": bf,
    }


# ------------------------------ Pure reference ------------------------------

def _upsample2x_bilinear_ac_nchw(x):
    """Independent numpy bilinear x2, align_corners=True (NCHW)."""
    B, C, H, W = x.shape
    OH, OW = 2 * H, 2 * W
    out = np.zeros((B, C, OH, OW), dtype=np.float32)
    sh = (H - 1) / (OH - 1)
    sw = (W - 1) / (OW - 1)
    for p in range(OH):
        sy = p * sh
        y0 = min(int(np.floor(sy)), H - 1)
        y1 = min(y0 + 1, H - 1)
        ty = sy - y0
        for q in range(OW):
            sx = q * sw
            x0 = min(int(np.floor(sx)), W - 1)
            x1 = min(x0 + 1, W - 1)
            tx = sx - x0
            out[:, :, p, q] = ((1 - ty) * (1 - tx) * x[:, :, y0, x0]
                               + (1 - ty) * tx * x[:, :, y0, x1]
                               + ty * (1 - tx) * x[:, :, y1, x0]
                               + ty * tx * x[:, :, y1, x1])
    return out


def reference_forward(x_nchw, feats_nchw, p):
    x = jnp.asarray(x_nchw, jnp.float32)
    f = jnp.asarray(feats_nchw, jnp.float32)

    def conv(inp, w, b, pad):
        y = lax.conv_general_dilated(
            inp, w, window_strides=(1, 1), padding=((pad, pad), (pad, pad)),
            dimension_numbers=("NCHW", "OIHW", "NCHW"),
            precision=lax.Precision.HIGHEST)
        return y + jnp.asarray(b).reshape(1, -1, 1, 1)

    lrelu = lambda t: jnp.where(t >= 0, t, 0.2 * t)
    h = lrelu(conv(x, p["w1_oihw"], p["b1"], 1))
    h = lrelu(conv(h, p["w2_oihw"], p["b2"], 1))
    s = h + conv(x, p["wr_oihw"], p["br"], 0)
    up = _upsample2x_bilinear_ac_nchw(np.asarray(s))
    mf = conv(f, p["wf_oihw"], p["bf"], 1)
    return jnp.asarray(up) + mf


# ----------------------------------- Main ------------------------------------

if __name__ == "__main__":
    in_channels, out_channels, feature_channels = 4, 8, 4
    B, H, W = 2, 16, 16

    key = jax.random.PRNGKey(0)
    k_x, k_f, k_p = jax.random.split(key, 3)
    x = jax.random.normal(k_x, (B, in_channels, H, W), jnp.float32)             # NCHW
    feats = jax.random.normal(k_f, (B, feature_channels, 2 * H, 2 * W), jnp.float32)

    params = init_params(k_p, in_channels, out_channels, feature_channels)
    ops = pack_operators(params, B, H, W)

    out = generator_residual_block(x, feats, ops)
    out = jax.block_until_ready(out)

    ref = reference_forward(x, feats, params)
    # bf16-operand / f32-accumulation MXU tolerance (incl. bf16 bilinear weights).
    np.testing.assert_allclose(np.asarray(out), np.asarray(ref),
                               atol=2.5e-2, rtol=2.5e-2)
    print("KERNEL_OK")
</pallas_src>

<mosaic_0001>
module attributes {stable_mosaic.version = 11 : i64} {
  func.func @_gen_res_block_kernel(%arg0: memref<32x64xbf16, #tpu.memory_space<vmem>>, %arg1: memref<64x128xbf16, #tpu.memory_space<vmem>>, %arg2: memref<192x128xbf16, #tpu.memory_space<vmem>>, %arg3: memref<1x128xf32, #tpu.memory_space<vmem>>, %arg4: memref<384x128xbf16, #tpu.memory_space<vmem>>, %arg5: memref<1x128xf32, #tpu.memory_space<vmem>>, %arg6: memref<64x128xbf16, #tpu.memory_space<vmem>>, %arg7: memref<1x128xf32, #tpu.memory_space<vmem>>, %arg8: memref<384x256xbf16, #tpu.memory_space<vmem>>, %arg9: memref<1x256xf32, #tpu.memory_space<vmem>>, %arg10: memref<64x32xbf16, #tpu.memory_space<vmem>>, %arg11: memref<128x256xbf16, #tpu.memory_space<vmem>>, %arg12: memref<64x256xf32, #tpu.memory_space<vmem>>) attributes {dimension_semantics = [], scalar_prefetch = 0 : i64, scratch_operands = 0 : i64, tpu.core_type = #tpu.core_type<tc>} {
    %c0 = arith.constant 0 : index
    %c0_0 = arith.constant 0 : index
    %0 = vector.load %arg0[%c0, %c0_0] : memref<32x64xbf16, #tpu.memory_space<vmem>>, vector<32x64xbf16>
    %c0_1 = arith.constant 0 : index
    %c0_2 = arith.constant 0 : index
    %1 = vector.load %arg1[%c0_1, %c0_2] : memref<64x128xbf16, #tpu.memory_space<vmem>>, vector<64x128xbf16>
    %2 = tpu.iota {dimensions = array<i32: 0>} : vector<32x1xi32>
    %c16_i32 = arith.constant 16 : i32
    %c0_i32 = arith.constant 0 : i32
    %3 = arith.cmpi eq, %c16_i32, %c0_i32 : i32
    %c1_i32 = arith.constant 1 : i32
    %4 = arith.select %3, %c1_i32, %c16_i32 : i32
    %5 = vector.broadcast %4 : i32 to vector<32x1xi32>
    %6 = arith.remsi %2, %5 : vector<32x1xi32>
    %c0_i32_3 = arith.constant 0 : i32
    %7 = vector.broadcast %c0_i32_3 : i32 to vector<32x1xi32>
    %8 = arith.cmpi ne, %6, %7 : vector<32x1xi32>
    %c0_i32_4 = arith.constant 0 : i32
    %9 = vector.broadcast %c0_i32_4 : i32 to vector<32x1xi32>
    %10 = arith.cmpi slt, %6, %9 : vector<32x1xi32>
    %c0_i32_5 = arith.constant 0 : i32
    %11 = arith.cmpi slt, %4, %c0_i32_5 : i32
    %12 = vector.broadcast %11 : i1 to vector<32x1xi1>
    %13 = vector.broadcast %12 : vector<32x1xi1> to vector<32x1xi1>
    %14 = arith.xori %10, %13 : vector<32x1xi1>
    %15 = arith.andi %14, %8 : vector<32x1xi1>
    %16 = vector.broadcast %4 : i32 to vector<32x1xi32>
    %17 = arith.addi %6, %16 : vector<32x1xi32>
    %18 = arith.select %15, %17, %6 : vector<32x1xi1>, vector<32x1xi32>
    %c0_i32_6 = arith.constant 0 : i32
    %19 = vector.broadcast %c0_i32_6 : i32 to vector<32x1xi32>
    %20 = arith.cmpi eq, %18, %19 : vector<32x1xi32>
    %c16_i32_7 = arith.constant 16 : i32
    %c0_i32_8 = arith.constant 0 : i32
    %21 = arith.cmpi eq, %c16_i32_7, %c0_i32_8 : i32
    %c1_i32_9 = arith.constant 1 : i32
    %22 = arith.select %21, %c1_i32_9, %c16_i32_7 : i32
    %23 = vector.broadcast %22 : i32 to vector<32x1xi32>
    %24 = arith.remsi %2, %23 : vector<32x1xi32>
    %c0_i32_10 = arith.constant 0 : i32
    %25 = vector.broadcast %c0_i32_10 : i32 to vector<32x1xi32>
    %26 = arith.cmpi ne, %24, %25 : vector<32x1xi32>
    %c0_i32_11 = arith.constant 0 : i32
    %27 = vector.broadcast %c0_i32_11 : i32 to vector<32x1xi32>
    %28 = arith.cmpi slt, %24, %27 : vector<32x1xi32>
    %c0_i32_12 = arith.constant 0 : i32
    %29 = arith.cmpi slt, %22, %c0_i32_12 : i32
    %30 = vector.broadcast %29 : i1 to vector<32x1xi1>
    %31 = vector.broadcast %30 : vector<32x1xi1> to vector<32x1xi1>
    %32 = arith.xori %28, %31 : vector<32x1xi1>
    %33 = arith.andi %32, %26 : vector<32x1xi1>
    %34 = vector.broadcast %22 : i32 to vector<32x1xi32>
    %35 = arith.addi %24, %34 : vector<32x1xi32>
    %36 = arith.select %33, %35, %24 : vector<32x1xi1>, vector<32x1xi32>
    %c15_i32 = arith.constant 15 : i32
    %37 = vector.broadcast %c15_i32 : i32 to vector<32x1xi32>
    %38 = arith.cmpi eq, %36, %37 : vector<32x1xi32>
    %39 = tpu.iota {dimensions = array<i32: 0>} : vector<64x1xi32>
    %c32_i32 = arith.constant 32 : i32
    %c0_i32_13 = arith.constant 0 : i32
    %40 = arith.cmpi eq, %c32_i32, %c0_i32_13 : i32
    %c1_i32_14 = arith.constant 1 : i32
    %41 = arith.select %40, %c1_i32_14, %c32_i32 : i32
    %42 = vector.broadcast %41 : i32 to vector<64x1xi32>
    %43 = arith.remsi %39, %42 : vector<64x1xi32>
    %c0_i32_15 = arith.constant 0 : i32
    %44 = vector.broadcast %c0_i32_15 : i32 to vector<64x1xi32>
    %45 = arith.cmpi ne, %43, %44 : vector<64x1xi32>
    %c0_i32_16 = arith.constant 0 : i32
    %46 = vector.broadcast %c0_i32_16 : i32 to vector<64x1xi32>
    %47 = arith.cmpi slt, %43, %46 : vector<64x1xi32>
    %c0_i32_17 = arith.constant 0 : i32
    %48 = arith.cmpi slt, %41, %c0_i32_17 : i32
    %49 = vector.broadcast %48 : i1 to vector<64x1xi1>
    %50 = vector.broadcast %49 : vector<64x1xi1> to vector<64x1xi1>
    %51 = arith.xori %47, %50 : vector<64x1xi1>
    %52 = arith.andi %51, %45 : vector<64x1xi1>
    %53 = vector.broadcast %41 : i32 to vector<64x1xi32>
    %54 = arith.addi %43, %53 : vector<64x1xi32>
    %55 = arith.select %52, %54, %43 : vector<64x1xi1>, vector<64x1xi32>
    %c0_i32_18 = arith.constant 0 : i32
    %56 = vector.broadcast %c0_i32_18 : i32 to vector<64x1xi32>
    %57 = arith.cmpi eq, %55, %56 : vector<64x1xi32>
    %c32_i32_19 = arith.constant 32 : i32
    %c0_i32_20 = arith.constant 0 : i32
    %58 = arith.cmpi eq, %c32_i32_19, %c0_i32_20 : i32
    %c1_i32_21 = arith.constant 1 : i32
    %59 = arith.select %58, %c1_i32_21, %c32_i32_19 : i32
    %60 = vector.broadcast %59 : i32 to vector<64x1xi32>
    %61 = arith.remsi %39, %60 : vector<64x1xi32>
    %c0_i32_22 = arith.constant 0 : i32
    %62 = vector.broadcast %c0_i32_22 : i32 to vector<64x1xi32>
    %63 = arith.cmpi ne, %61, %62 : vector<64x1xi32>
    %c0_i32_23 = arith.constant 0 : i32
    %64 = vector.broadcast %c0_i32_23 : i32 to vector<64x1xi32>
    %65 = arith.cmpi slt, %61, %64 : vector<64x1xi32>
    %c0_i32_24 = arith.constant 0 : i32
    %66 = arith.cmpi slt, %59, %c0_i32_24 : i32
    %67 = vector.broadcast %66 : i1 to vector<64x1xi1>
    %68 = vector.broadcast %67 : vector<64x1xi1> to vector<64x1xi1>
    %69 = arith.xori %65, %68 : vector<64x1xi1>
    %70 = arith.andi %69, %63 : vector<64x1xi1>
    %71 = vector.broadcast %59 : i32 to vector<64x1xi32>
    %72 = arith.addi %61, %71 : vector<64x1xi32>
    %73 = arith.select %70, %72, %61 : vector<64x1xi1>, vector<64x1xi32>
    %c31_i32 = arith.constant 31 : i32
    %74 = vector.broadcast %c31_i32 : i32 to vector<64x1xi32>
    %75 = arith.cmpi eq, %73, %74 : vector<64x1xi32>
    %cst = arith.constant 0.000000e+00 : bf16
    %76 = vector.broadcast %cst : bf16 to vector<32x64xbf16>
    %cst_25 = arith.constant 0.000000e+00 : bf16
    %77 = vector.broadcast %cst_25 : bf16 to vector<1x64xbf16>
    %78 = vector.extract_strided_slice %0 {offsets = [0, 0], sizes = [31, 64], strides = [1, 1]} : vector<32x64xbf16> to vector<31x64xbf16>
    %79 = tpu.concatenate %77, %78 in 0 : vector<1x64xbf16>, vector<31x64xbf16> -> vector<32x64xbf16>
    %80 = vector.shape_cast %20 : vector<32x1xi1> to vector<32x1xi1>
    %81 = vector.broadcast %80 : vector<32x1xi1> to vector<32x64xi1>
    %82 = arith.select %81, %76, %79 : vector<32x64xi1>, vector<32x64xbf16>
    %83 = vector.extract_strided_slice %0 {offsets = [1, 0], sizes = [31, 64], strides = [1, 1]} : vector<32x64xbf16> to vector<31x64xbf16>
    %84 = tpu.concatenate %83, %77 in 0 : vector<31x64xbf16>, vector<1x64xbf16> -> vector<32x64xbf16>
    %85 = vector.shape_cast %38 : vector<32x1xi1> to vector<32x1xi1>
    %86 = vector.broadcast %85 : vector<32x1xi1> to vector<32x64xi1>
    %87 = arith.select %86, %76, %84 : vector<32x64xi1>, vector<32x64xbf16>
    %88 = tpu.concatenate %82, %0, %87 in 1 : vector<32x64xbf16>, vector<32x64xbf16>, vector<32x64xbf16> -> vector<32x192xbf16>
    %c0_26 = arith.constant 0 : index
    %c0_27 = arith.constant 0 : index
    %89 = vector.load %arg2[%c0_26, %c0_27] : memref<192x128xbf16, #tpu.memory_space<vmem>>, vector<192x128xbf16>
    %cst_28 = arith.constant dense<0.000000e+00> : vector<32x128xf32>
    %90 = tpu.matmul %88, %89, %cst_28 {dimension_numbers = #tpu.dot_dimension_numbers<[1], [0], [0], [1], [0, 0, 1, 1], [], []>} : vector<32x192xbf16>, vector<192x128xbf16>, vector<32x128xf32> -> vector<32x128xf32>
    %c0_29 = arith.constant 0 : index
    %c0_30 = arith.constant 0 : index
    %91 = vector.load %arg3[%c0_29, %c0_30] : memref<1x128xf32, #tpu.memory_space<vmem>>, vector<1x128xf32>
    %92 = vector.broadcast %91 : vector<1x128xf32> to vector<32x128xf32>
    %93 = arith.addf %90, %92 : vector<32x128xf32>
    %cst_31 = arith.constant 2.000000e-01 : f32
    %94 = vector.broadcast %cst_31 : f32 to vector<32x128xf32>
    %95 = arith.mulf %94, %93 : vector<32x128xf32>
    %96 = arith.maximumf %93, %95 : vector<32x128xf32>
    %97 = arith.truncf %96 : vector<32x128xf32> to vector<32x128xbf16>
    %cst_32 = arith.constant 0.000000e+00 : bf16
    %98 = vector.broadcast %cst_32 : bf16 to vector<32x128xbf16>
    %cst_33 = arith.constant 0.000000e+00 : bf16
    %99 = vector.broadcast %cst_33 : bf16 to vector<1x128xbf16>
    %100 = vector.extract_strided_slice %97 {offsets = [0, 0], sizes = [31, 128], strides = [1, 1]} : vector<32x128xbf16> to vector<31x128xbf16>
    %101 = tpu.concatenate %99, %100 in 0 : vector<1x128xbf16>, vector<31x128xbf16> -> vector<32x128xbf16>
    %102 = vector.shape_cast %20 : vector<32x1xi1> to vector<32x1xi1>
    %103 = vector.broadcast %102 : vector<32x1xi1> to vector<32x128xi1>
    %104 = arith.select %103, %98, %101 : vector<32x128xi1>, vector<32x128xbf16>
    %105 = vector.extract_strided_slice %97 {offsets = [1, 0], sizes = [31, 128], strides = [1, 1]} : vector<32x128xbf16> to vector<31x128xbf16>
    %106 = tpu.concatenate %105, %99 in 0 : vector<31x128xbf16>, vector<1x128xbf16> -> vector<32x128xbf16>
    %107 = vector.shape_cast %38 : vector<32x1xi1> to vector<32x1xi1>
    %108 = vector.broadcast %107 : vector<32x1xi1> to vector<32x128xi1>
    %109 = arith.select %108, %98, %106 : vector<32x128xi1>, vector<32x128xbf16>
    %110 = tpu.concatenate %104, %97, %109 in 1 : vector<32x128xbf16>, vector<32x128xbf16>, vector<32x128xbf16> -> vector<32x384xbf16>
    %c0_34 = arith.constant 0 : index
    %c0_35 = arith.constant 0 : index
    %111 = vector.load %arg4[%c0_34, %c0_35] : memref<384x128xbf16, #tpu.memory_space<vmem>>, vector<384x128xbf16>
    %cst_36 = arith.constant dense<0.000000e+00> : vector<32x128xf32>
    %112 = tpu.matmul %110, %111, %cst_36 {dimension_numbers = #tpu.dot_dimension_numbers<[1], [0], [0], [1], [0, 0, 1, 1], [], []>} : vector<32x384xbf16>, vector<384x128xbf16>, vector<32x128xf32> -> vector<32x128xf32>
    %c0_37 = arith.constant 0 : index
    %c0_38 = arith.constant 0 : index
    %113 = vector.load %arg5[%c0_37, %c0_38] : memref<1x128xf32, #tpu.memory_space<vmem>>, vector<1x128xf32>
    %114 = vector.broadcast %113 : vector<1x128xf32> to vector<32x128xf32>
    %115 = arith.addf %112, %114 : vector<32x128xf32>
    %cst_39 = arith.constant 2.000000e-01 : f32
    %116 = vector.broadcast %cst_39 : f32 to vector<32x128xf32>
    %117 = arith.mulf %116, %115 : vector<32x128xf32>
    %118 = arith.maximumf %115, %117 : vector<32x128xf32>
    %c0_40 = arith.constant 0 : index
    %c0_41 = arith.constant 0 : index
    %119 = vector.load %arg6[%c0_40, %c0_41] : memref<64x128xbf16, #tpu.memory_space<vmem>>, vector<64x128xbf16>
    %cst_42 = arith.constant dense<0.000000e+00> : vector<32x128xf32>
    %120 = tpu.matmul %0, %119, %cst_42 {dimension_numbers = #tpu.dot_dimension_numbers<[1], [0], [0], [1], [0, 0, 1, 1], [], []>} : vector<32x64xbf16>, vector<64x128xbf16>, vector<32x128xf32> -> vector<32x128xf32>
    %c0_43 = arith.constant 0 : index
    %c0_44 = arith.constant 0 : index
    %121 = vector.load %arg7[%c0_43, %c0_44] : memref<1x128xf32, #tpu.memory_space<vmem>>, vector<1x128xf32>
    %122 = vector.broadcast %121 : vector<1x128xf32> to vector<32x128xf32>
    %123 = arith.addf %120, %122 : vector<32x128xf32>
    %124 = arith.addf %118, %123 : vector<32x128xf32>
    %125 = arith.truncf %124 : vector<32x128xf32> to vector<32x128xbf16>
    %c0_45 = arith.constant 0 : index
    %c0_46 = arith.constant 0 : index
    %126 = vector.load %arg11[%c0_45, %c0_46] : memref<128x256xbf16, #tpu.memory_space<vmem>>, vector<128x256xbf16>
    %cst_47 = arith.constant dense<0.000000e+00> : vector<32x256xf32>
    %127 = tpu.matmul %125, %126, %cst_47 {dimension_numbers = #tpu.dot_dimension_numbers<[1], [0], [0], [1], [0, 0, 1, 1], [], []>} : vector<32x128xbf16>, vector<128x256xbf16>, vector<32x256xf32> -> vector<32x256xf32>
    %c0_48 = arith.constant 0 : index
    %c0_49 = arith.constant 0 : index
    %128 = vector.load %arg10[%c0_48, %c0_49] : memref<64x32xbf16, #tpu.memory_space<vmem>>, vector<64x32xbf16>
    %129 = arith.truncf %127 : vector<32x256xf32> to vector<32x256xbf16>
    %cst_50 = arith.constant dense<0.000000e+00> : vector<64x256xf32>
    %130 = tpu.matmul %128, %129, %cst_50 {dimension_numbers = #tpu.dot_dimension_numbers<[1], [0], [0], [1], [0, 0, 1, 1], [], []>} : vector<64x32xbf16>, vector<32x256xbf16>, vector<64x256xf32> -> vector<64x256xf32>
    %cst_51 = arith.constant 0.000000e+00 : bf16
    %131 = vector.broadcast %cst_51 : bf16 to vector<64x128xbf16>
    %cst_52 = arith.constant 0.000000e+00 : bf16
    %132 = vector.broadcast %cst_52 : bf16 to vector<1x128xbf16>
    %133 = vector.extract_strided_slice %1 {offsets = [0, 0], sizes = [63, 128], strides = [1, 1]} : vector<64x128xbf16> to vector<63x128xbf16>
    %134 = tpu.concatenate %132, %133 in 0 : vector<1x128xbf16>, vector<63x128xbf16> -> vector<64x128xbf16>
    %135 = vector.shape_cast %57 : vector<64x1xi1> to vector<64x1xi1>
    %136 = vector.broadcast %135 : vector<64x1xi1> to vector<64x128xi1>
    %137 = arith.select %136, %131, %134 : vector<64x128xi1>, vector<64x128xbf16>
    %138 = vector.extract_strided_slice %1 {offsets = [1, 0], sizes = [63, 128], strides = [1, 1]} : vector<64x128xbf16> to vector<63x128xbf16>
    %139 = tpu.concatenate %138, %132 in 0 : vector<63x128xbf16>, vector<1x128xbf16> -> vector<64x128xbf16>
    %140 = vector.shape_cast %75 : vector<64x1xi1> to vector<64x1xi1>
    %141 = vector.broadcast %140 : vector<64x1xi1> to vector<64x128xi1>
    %142 = arith.select %141, %131, %139 : vector<64x128xi1>, vector<64x128xbf16>
    %143 = tpu.concatenate %137, %1, %142 in 1 : vector<64x128xbf16>, vector<64x128xbf16>, vector<64x128xbf16> -> vector<64x384xbf16>
    %c0_53 = arith.constant 0 : index
    %c0_54 = arith.constant 0 : index
    %144 = vector.load %arg8[%c0_53, %c0_54] : memref<384x256xbf16, #tpu.memory_space<vmem>>, vector<384x256xbf16>
    %cst_55 = arith.constant dense<0.000000e+00> : vector<64x256xf32>
    %145 = tpu.matmul %143, %144, %cst_55 {dimension_numbers = #tpu.dot_dimension_numbers<[1], [0], [0], [1], [0, 0, 1, 1], [], []>} : vector<64x384xbf16>, vector<384x256xbf16>, vector<64x256xf32> -> vector<64x256xf32>
    %c0_56 = arith.constant 0 : index
    %c0_57 = arith.constant 0 : index
    %146 = vector.load %arg9[%c0_56, %c0_57] : memref<1x256xf32, #tpu.memory_space<vmem>>, vector<1x256xf32>
    %147 = vector.broadcast %146 : vector<1x256xf32> to vector<64x256xf32>
    %148 = arith.addf %145, %147 : vector<64x256xf32>
    %149 = arith.addf %130, %148 : vector<64x256xf32>
    %c0_58 = arith.constant 0 : index
    %c0_59 = arith.constant 0 : index
    %150 = vector.load %arg12[%c0_58, %c0_59] : memref<64x256xf32, #tpu.memory_space<vmem>>, vector<64x256xf32>
    tpu.vector_store %arg12[%c0_58, %c0_59], %149 {strides = array<i32>} : memref<64x256xf32, #tpu.memory_space<vmem>>, vector<64x256xf32>,
    return
  }
}

</mosaic_0001>

<bundles_post_ra>
// kernel: tpu_custom_call.1
= control target key start
LH: loop header
LB: loop body
LE: loop exit
PB: predicated region body
PF: predicated region fallthrough
CT: control target
= control target key end

     0   :  { %17 = vsyncpa [#allocation3], 0  ;;  %s3136_s0 = inlined_call_operand.hbm [shape: bf16[32,64], index: 0, kind: input, shape index: {}]   ;;  %s3137_s1 = inlined_call_operand.vmem [shape: bf16[64,128], index: 1, kind: input, shape index: {}]   ;;  %s3138_s2 = inlined_call_operand.hbm [shape: bf16[192,128], index: 2, kind: input, shape index: {}]   ;;  %s3139_s3 = inlined_call_operand.hbm [shape: f32[1,128], index: 3, kind: input, shape index: {}]   ;;  %s3140_s4 = inlined_call_operand.hbm [shape: bf16[384,128], index: 4, kind: input, shape index: {}]   ;;  %s3141_s5 = inlined_call_operand.hbm [shape: f32[1,128], index: 5, kind: input, shape index: {}]   ;;  %s3142_s6 = inlined_call_operand.vmem [shape: bf16[64,128], index: 6, kind: input, shape index: {}]   ;;  %s3143_s7 = inlined_call_operand.hbm [shape: f32[1,128], index: 7, kind: input, shape index: {}]   ;;  %s3144_s8 = inlined_call_operand.hbm [shape: bf16[384,256], index: 8, kind: input, shape index: {}]   ;;  %s3145_s9 = inlined_call_operand.vmem [shape: f32[1,256], index: 9, kind: input, shape index: {}]   ;;  %s3146_s10 = inlined_call_operand.vmem [shape: bf16[64,32], index: 10, kind: input, shape index: {}]   ;;  %s3147_s11 = inlined_call_operand.hbm [shape: bf16[128,256], index: 11, kind: input, shape index: {}]   ;;  %s3148_s12 = inlined_call_operand.hbm [shape: f32[64,256], index: 12, kind: output, shape index: {}]  }
   0x1   :  { %18 = vsyncpa [#allocation6], 0 }
   0x2   :  { %19 = vsyncpa [#allocation9], 0 }
   0x3   :  { %20 = vsyncpa [#allocation12], 0 }
   0x4   :  { %21 = vsyncpa [#allocation15], 0 }
   0x5   :  { %22 = vsyncpa [#allocation4], 0  ;;  %s2645_s21 = smov [#allocation5]   ;;  %s2646_s23 = smov [#allocation8]  }
   0x6   :  { %s42_s22 = sshll.u32 %s2645_s21, 4  ;;  %s64_s24 = sshll.u32 %s2646_s23, 4  ;;  %s43_s22 = int_to_ptr.vmem [resolvable:$true] %s42_s22  ;;  %s2727_s24 = int_to_ptr.vmem [resolvable:$true] %s64_s24 }
   0x7   :  { %s2435_s27 = scalar_lea.hbm %s3138_s2, 1536 }
   0x8   :  { %p2436_p0 = scmp.ne.s32.totalorder %s3138_s2, %s2435_s27  ;;  %p2439_p1 = scmp.lt.u32.totalorder %s2435_s27, %s3138_s2 }
   0xa   :  { %p2441_p2 = pnand %p2439_p1, %p2436_p0 }
   0xc   :  { %2444 = shalt.err (!%p2441_p2)
}
   0xd   :  { %s2445_s14 = scalar_lea.vmem %s43_s22, 1536  ;;  %p2450_p4 = scmp.lt.s32.totalorder %s43_s22, %s43_s22 }
   0xe   :  { %p2446_p3 = scmp.ne.s32.totalorder %s43_s22, %s2445_s14  ;;  %p2451_p5 = scmp.lt.s32.totalorder %s2445_s14, %s2445_s14 }
  0x10   :  { %p2452_p6 = por %p2451_p5, %p2450_p4 }
  0x12   :  { %p2453_p7 = pnand %p2452_p6, %p2446_p3 }
  0x14   :  { %2456 = shalt.err (!%p2453_p7)
}
  0x15   :  { %s2647_s15 = smov 64   ;;  %s2648_s16 = smov 4  }
  0x16   :  { %48 = dma.hbm_to_vmem [thread:$0]  %s3138_s2, 1536, %s43_s22, [#allocation6], %s2647_s15, %s2647_s15, %s2648_s16  }
  0x17   :  { %s2457_s21 = scalar_lea.hbm %s3140_s4, 3072 }
  0x18   :  { %p2458_p8 = scmp.ne.s32.totalorder %s3140_s4, %s2457_s21  ;;  %p2461_p9 = scmp.lt.u32.totalorder %s2457_s21, %s3140_s4 }
  0x1a   :  { %p2463_p10 = pnand %p2461_p9, %p2458_p8 }
  0x1c   :  { %2466 = shalt.err (!%p2463_p10)
}
  0x1d   :  { %s2467_s28 = scalar_lea.vmem %s2727_s24, 3072  ;;  %p2472_p12 = scmp.lt.s32.totalorder %s2727_s24, %s2727_s24 }
  0x1e   :  { %p2468_p11 = scmp.ne.s32.totalorder %s2727_s24, %s2467_s28  ;;  %p2473_p13 = scmp.lt.s32.totalorder %s2467_s28, %s2467_s28 }
  0x20   :  { %p2474_p0 = por %p2473_p13, %p2472_p12 }
  0x22   :  { %p2475_p1 = pnand %p2474_p0, %p2468_p11 }
  0x24   :  { %2478 = shalt.err (!%p2475_p1)
}
  0x25   :  { %70 = dma.hbm_to_vmem [thread:$0]  %s3140_s4, 3072, %s2727_s24, [#allocation9], %s2647_s15, %s2647_s15, %s2648_s16  }
  0x26   :  { %s2649_s29 = smov [#allocation11]   ;;  %s2650_s13 = smov [#allocation2]  }
  0x27   :  { %s89_s30 = sshll.u32 %s2649_s29, 4  ;;  %s28_s14 = sshll.u32 %s2650_s13, 4  ;;  %s90_s30 = int_to_ptr.vmem [resolvable:$true] %s89_s30  ;;  %s2764_s14 = int_to_ptr.vmem [resolvable:$true] %s28_s14 }
  0x28   :  { %s2479_s19 = scalar_lea.hbm %s3143_s7, 16 }
  0x29   :  { %p2480_p2 = scmp.ne.s32.totalorder %s3143_s7, %s2479_s19  ;;  %p2483_p3 = scmp.lt.u32.totalorder %s2479_s19, %s3143_s7 }
  0x2b   :  { %p2485_p4 = pnand %p2483_p3, %p2480_p2 }
  0x2d   :  { %2488 = shalt.err (!%p2485_p4)
}
  0x2e   :  { %s2489_s4 = scalar_lea.vmem %s90_s30, 16  ;;  %s2493_s24 = scalar_lea.vmem %s90_s30, 32 }
  0x2f   :  { %p2490_p5 = scmp.ne.s32.totalorder %s90_s30, %s2489_s4  ;;  %p2494_p6 = scmp.lt.s32.totalorder %s90_s30, %s90_s30 }
  0x30   :  { %p2495_p7 = scmp.lt.s32.totalorder %s2493_s24, %s2489_s4 }
  0x32   :  { %p2496_p8 = por %p2495_p7, %p2494_p6 }
  0x34   :  { %p2497_p9 = pnand %p2496_p8, %p2490_p5 }
  0x36   :  { %2500 = shalt.err (!%p2497_p9)
}
  0x37   :  { %92 = dma.hbm_to_vmem [thread:$0]  %s3143_s7, 16, %s90_s30, [#allocation12]  }
  0x38   :  { %s2501_s22 = scalar_lea.hbm %s3136_s0, 256 }
  0x39   :  { %p2502_p10 = scmp.ne.s32.totalorder %s3136_s0, %s2501_s22  ;;  %p2505_p11 = scmp.lt.u32.totalorder %s2501_s22, %s3136_s0 }
  0x3b   :  { %p2507_p12 = pnand %p2505_p11, %p2502_p10 }
  0x3d   :  { %2510 = shalt.err (!%p2507_p12)
}
  0x3e   :  { %s2511_s19 = scalar_lea.vmem %s2764_s14, 256  ;;  %p2516_p0 = scmp.lt.s32.totalorder %s2764_s14, %s2764_s14 }
  0x3f   :  { %p2512_p13 = scmp.ne.s32.totalorder %s2764_s14, %s2511_s19  ;;  %p2517_p1 = scmp.lt.s32.totalorder %s2511_s19, %s2511_s19 }
  0x41   :  { %p2518_p2 = por %p2517_p1, %p2516_p0 }
  0x43   :  { %p2519_p3 = pnand %p2518_p2, %p2512_p13 }
  0x45   :  { %2522 = shalt.err (!%p2519_p3)
}
  0x46   :  { %34 = dma.hbm_to_vmem [thread:$0]  %s3136_s0, 256, %s2764_s14, [#allocation3], %s2647_s15, %s2647_s15, %s2648_s16  }
  0x47   :  { %s2651_s20 = smov [#allocation7]   ;;  %s2652_s23 = smov [#allocation10]  }
  0x48   :  { %s55_s21 = sshll.u32 %s2651_s20, 4  ;;  %s77_s25 = sshll.u32 %s2652_s23, 4  ;;  %s56_s21 = int_to_ptr.vmem [resolvable:$true] %s55_s21  ;;  %s78_s25 = int_to_ptr.vmem [resolvable:$true] %s77_s25 }
  0x49   :  { %s2523_s26 = scalar_lea.hbm %s3139_s3, 16 }
  0x4a   :  { %p2524_p4 = scmp.ne.s32.totalorder %s3139_s3, %s2523_s26  ;;  %p2527_p5 = scmp.lt.u32.totalorder %s2523_s26, %s3139_s3 }
  0x4c   :  { %p2529_p6 = pnand %p2527_p5, %p2524_p4 }
  0x4e   :  { %2532 = shalt.err (!%p2529_p6)
}
  0x4f   :  { %s2533_s0 = scalar_lea.vmem %s56_s21, 16  ;;  %s2537_s16 = scalar_lea.vmem %s56_s21, 32 }
  0x50   :  { %p2534_p7 = scmp.ne.s32.totalorder %s56_s21, %s2533_s0  ;;  %p2538_p8 = scmp.lt.s32.totalorder %s56_s21, %s56_s21 }
  0x51   :  { %p2539_p9 = scmp.lt.s32.totalorder %s2537_s16, %s2533_s0 }
  0x53   :  { %p2540_p10 = por %p2539_p9, %p2538_p8 }
  0x55   :  { %p2541_p11 = pnand %p2540_p10, %p2534_p7 }
  0x57   :  { %2544 = shalt.err (!%p2541_p11)
}
  0x58   :  { %58 = dma.hbm_to_vmem [thread:$0]  %s3139_s3, 16, %s56_s21, [#allocation6]  }
  0x59   :  { %s2545_s18 = scalar_lea.hbm %s3141_s5, 16 }
  0x5a   :  { %p2546_p12 = scmp.ne.s32.totalorder %s3141_s5, %s2545_s18  ;;  %p2549_p13 = scmp.lt.u32.totalorder %s2545_s18, %s3141_s5 }
  0x5c   :  { %p2551_p0 = pnand %p2549_p13, %p2546_p12 }
  0x5e   :  { %2554 = shalt.err (!%p2551_p0)
}
  0x5f   :  { %s2555_s23 = scalar_lea.vmem %s78_s25, 16  ;;  %s2559_s4 = scalar_lea.vmem %s78_s25, 32 }
  0x60   :  { %p2556_p1 = scmp.ne.s32.totalorder %s78_s25, %s2555_s23  ;;  %p2560_p2 = scmp.lt.s32.totalorder %s78_s25, %s78_s25 }
  0x61   :  { %p2561_p3 = scmp.lt.s32.totalorder %s2559_s4, %s2555_s23 }
  0x63   :  { %p2562_p4 = por %p2561_p3, %p2560_p2 }
  0x65   :  { %p2563_p5 = pnand %p2562_p4, %p2556_p1 }
  0x67   :  { %2566 = shalt.err (!%p2563_p5)
}
  0x68   :  { %80 = dma.hbm_to_vmem [thread:$0]  %s3141_s5, 16, %s78_s25, [#allocation9]  }
  0x69   :  { %s2653_s24 = smov [#allocation13]   ;;  %s2567_s2 = scalar_lea.hbm %s3144_s8, 6144 }
  0x6a   :  { %s98_s26 = sshll.u32 %s2653_s24, 4  ;;  %p2568_p6 = scmp.ne.s32.totalorder %s3144_s8, %s2567_s2  ;;  %s99_s26 = int_to_ptr.vmem [resolvable:$true] %s98_s26 }
  0x6b   :  { %p2571_p7 = scmp.lt.u32.totalorder %s2567_s2, %s3144_s8 }
  0x6d   :  { %p2573_p8 = pnand %p2571_p7, %p2568_p6 }
  0x6f   :  { %2576 = shalt.err (!%p2573_p8)
}
  0x70   :  { %s2577_s29 = scalar_lea.vmem %s99_s26, 6144  ;;  %p2582_p10 = scmp.lt.s32.totalorder %s99_s26, %s99_s26 }
  0x71   :  { %p2578_p9 = scmp.ne.s32.totalorder %s99_s26, %s2577_s29  ;;  %p2583_p11 = scmp.lt.s32.totalorder %s2577_s29, %s2577_s29 }
  0x73   :  { %p2584_p12 = por %p2583_p11, %p2582_p10 }
  0x75   :  { %p2585_p13 = pnand %p2584_p12, %p2578_p9 }
  0x77   :  { %2588 = shalt.err (!%p2585_p13)
}
  0x78   :  { %s2654_s5 = smov 128   ;;  %s2655_s25 = smov 8  }
  0x79   :  { %104 = dma.hbm_to_vmem [thread:$0]  %s3144_s8, 6144, %s99_s26, [#allocation12], %s2654_s5, %s2654_s5, %s2655_s25  }
  0x7a   :  { %s2656_s18 = smov [#allocation14]   ;;  %s2589_s20 = scalar_lea.hbm %s3147_s11, 2048 }
  0x7b   :  { %s114_s19 = sshll.u32 %s2656_s18, 4  ;;  %p2590_p0 = scmp.ne.s32.totalorder %s3147_s11, %s2589_s20  ;;  %s115_s19 = int_to_ptr.vmem [resolvable:$true] %s114_s19 }
  0x7c   :  { %p2593_p1 = scmp.lt.u32.totalorder %s2589_s20, %s3147_s11 }
  0x7e   :  { %p2595_p2 = pnand %p2593_p1, %p2590_p0 }
  0x80   :  { %2598 = shalt.err (!%p2595_p2)
}
  0x81   :  { %s2599_s24 = scalar_lea.vmem %s115_s19, 2048  ;;  %p2604_p4 = scmp.lt.s32.totalorder %s115_s19, %s115_s19 }
  0x82   :  { %p2600_p3 = scmp.ne.s32.totalorder %s115_s19, %s2599_s24  ;;  %p2605_p5 = scmp.lt.s32.totalorder %s2599_s24, %s2599_s24 }
  0x84   :  { %p2606_p6 = por %p2605_p5, %p2604_p4 }
  0x86   :  { %p2607_p7 = pnand %p2606_p6, %p2600_p3 }
  0x88   :  { %2610 = shalt.err (!%p2607_p7)
}
  0x89   :  { %120 = dma.hbm_to_vmem [thread:$0]  %s3147_s11, 2048, %s115_s19, [#allocation15], %s2654_s5, %s2654_s5, %s2655_s25  }
  0x8a   :  { %2633 = dma.done.wait [#allocation3], 256  }
  0x8b   :  { %2634 = vsyncadd [#allocation3], 4294967040 }
  0x8c   :  { %2635 = dma.done.wait [#allocation6], 1552  }
  0x8d   :  { %2636 = vsyncadd [#allocation6], 4294965744 }
  0x8e   :  { %2637 = dma.done.wait [#allocation9], 3088  }
  0x8f   :  { %2638 = vsyncadd [#allocation9], 4294964208 }
  0x90   :  { %2639 = dma.done.wait [#allocation12], 6160  }
  0x91   :  { %2640 = vsyncadd [#allocation12], 4294961136 }
  0x92   :  { %2641 = dma.done.wait [#allocation15], 2048  }
  0x93   :  { %2642 = vsyncadd [#allocation15], 4294965248  ;;  %v2657_v0 = vmov 0   ;;  %v160_v1 = vlaneseq  ;;  %v2849_v3 = vld [vmem:[#allocation2] sm:$0xff]   ;;  %v2851_v4 = vld [vmem:[#allocation2 + $0x8] sm:$0xff]   ;;  %vm2658_vm0 = vmmov 0  }
  0x94   :  { %553 = vmatprep.subr.bf16.mxu0 %v2657_v0  ;;  %431 = vrot.lane.b32.xlu0 %v2849_v3, %s2647_s15  ;;  %v2291_v5 = vld [vmem:[#allocation5] sm:$0xff]   ;;  %v349_v7 = vshrl.u32 %v2849_v3, 16  ;;  %v2292_v8 = vld [vmem:[#allocation5 + $0x8] sm:$0xff]   ;;  %v352_v9 = vshll.u32 %v2849_v3, 16  ;;  %v2293_v11 = vld [vmem:[#allocation5 + $0x10] sm:$0xff]   ;;  %v359_v13 = vshll.u32 %v2851_v4, 16 }
  0x95   :  { %v2847_v2 = vshrl.u32 %v160_v1, 7  ;;  %554 = vmatpush1.bf16.msra.mxu0 %v2291_v5  ;;  %v356_v16 = vshrl.u32 %v2851_v4, 16  ;;  %vm377_vm1 = vmpackc.low %vm2658_vm0, %vm2658_vm0  ;;  %vm394_vm2 = vsmask.f32 7424  ;;  %v2294_v17 = vld [vmem:[#allocation5 + $0x18] sm:$0xff]   ;;  %v2295_v24 = vld [vmem:[#allocation5 + $0x20] sm:$0xff]  }
  0x96   :  { %555 = vmatprep.subr.bf16.mxu0 %v2657_v0  ;;  %v351_v12 = vrot.slane %v349_v7, 7  ;;  %v395_v14 = vrot.slane %v352_v9, 1  ;;  %v2866_v19 = vrot.slane %v359_v13, 1  ;;  %v2872_v21 = vsel %vm377_vm1, 65537, %v2657_v0  ;;  %v2296_v30 = vld [vmem:[#allocation5 + $0x28] sm:$0xff]   ;;  %v2297_v32 = vld [vmem:[#allocation5 + $0x30] sm:$0xff]  }
  0x97   :  { %v162_v6 = vadd.s32 8, %v2847_v2  ;;  %v358_v20 = vrot.slane %v356_v16, 7  ;;  %vm347_vm5 = vsmask.f32 256  ;;  %vm435_vm6 = vcmask 523264   ;;  %v2308_v31 = vld [vmem:[#allocation8 + $0x80] sm:$0xff]  }
  0x98   :  { %433 = vrot.lane.b32.xlu0 %v2851_v4, %s2647_s15  ;;  %v2863_v15 = vor.u32 %v352_v9, %v351_v12  ;;  %v396_v18 = vor.u32 %v395_v14, %v349_v7  ;;  %2188 = vmatprep.subr.bf16.mxu1 %v2308_v31  ;;  %v2311_v33 = vld [vmem:[#allocation8 + $0x88] sm:$0xff]   ;;  %v2298_v34 = vld [vmem:[#allocation5 + $0x38] sm:$0xff]   ;;  %v2299_v35 = vld [vmem:[#allocation5 + $0x40] sm:$0xff]   ;;  %v2897_v40 = vadd.s32 24, %v2847_v2  ;;  %v169_v41 = vand.u32 15, %v2847_v2 }
  0x99   :  { %v176_v10 = vand.u32 15, %v162_v6  ;;  %556 = vmatpush1.bf16.msra.mxu0 %v2292_v8  ;;  %v361_v22 = vor.u32 %v359_v13, %v358_v20  ;;  %2189 = vmatpush3.bf16.msra.mxu1 %v2308_v31  ;;  %v2300_v36 = vld [vmem:[#allocation5 + $0x48] sm:$0xff]   ;;  %v2301_v37 = vld [vmem:[#allocation5 + $0x50] sm:$0xff]   ;;  %v2302_v38 = vld [vmem:[#allocation5 + $0x58] sm:$0xff]   ;;  %v163_v43 = vadd.s32 16, %v2847_v2  ;;  %vm365_vm13 = vcmask 1040384  }
  0x9a   :  { %557 = vmatprep.subr.bf16.mxu0 %v2657_v0  ;;  %v398_v25 = vsel %vm394_vm2, %v396_v18, %v2866_v19  ;;  %2190 = vmatprep.subr.bf16.mxu1 %v2311_v33  ;;  %v2303_v39 = vld [vmem:[#allocation8 + $0x40] sm:$0xff]   ;;  %v190_v42 = vand.u32 15, %v2897_v40  ;;  %vm213_vm8 = vcmp.eq.s32.totalorder %v169_v41, 0  ;;  %vm402_vm14 = vcmask 1047552   ;;  %vm2906_vm0 = vmand %vm365_vm13, %vm347_vm5  ;;  %v2305_v62 = vld [vmem:[#allocation8 + $0x48] sm:$0xff]  }
  0x9b   :  { %vm218_vm3 = vcmp.eq.s32.totalorder %v176_v10, 15  ;;  %v2879_v27 = vsel %vm347_vm5, %v351_v12, %v361_v22  ;;  %v183_v44 = vand.u32 15, %v163_v43  ;;  %vm376_vm10 = vmpackc.low %vm213_vm8, %vm213_vm8  ;;  %v399_v49 = vor.u32 %v2866_v19, %v356_v16  ;;  %v2304_v59 = vld [vmem:[#allocation8] sm:$0xff]   ;;  %v2306_v5 = vld [vmem:[#allocation8 + $0x8] sm:$0xff]  }
  0x9c   :  { %vm414_vm4 = vmpackc.low %vm218_vm3, %vm218_vm3  ;;  %vm220_vm9 = vcmp.eq.s32.totalorder %v190_v42, 15  ;;  %v380_v45 = vsel %vm376_vm10, 65537, %v2657_v0  ;;  %v367_v53 = vsel %vm2906_vm0, 0, %v2863_v15  ;;  %v2307_v8 = vld [vmem:[#allocation8 + $0x50] sm:$0xff]   ;;  %v2312_v12 = vld [vmem:[#allocation8 + $0x18] sm:$0xff]  }
  0x9d   :  { %558 = vmatpush1.bf16.msra.mxu0 %v2293_v11  ;;  %v418_v23 = vsel %vm414_vm4, 65537, %v2657_v0  ;;  %2191 = vmatpush3.bf16.msra.mxu1 %v2311_v33  ;;  %vm416_vm11 = vmpackc.low %vm220_vm9, %vm220_vm9  ;;  %vm215_vm12 = vcmp.eq.s32.totalorder %v183_v44, 0  ;;  %v1977_v47 = vcombine.low %v380_v45, %v2872_v21  ;;  %v2309_v10 = vld [vmem:[#allocation8 + $0x10] sm:$0xff]   ;;  %v2310_v11 = vld [vmem:[#allocation8 + $0x58] sm:$0xff]  }
  0x9e   :  { %559 = vmatprep.subr.bf16.mxu0 %v2657_v0  ;;  %v1979_v26 = vcombine.low %v2872_v21, %v418_v23  ;;  %v420_v46 = vsel %vm416_vm11, 65537, %v2657_v0  ;;  %vm378_vm15 = vmpackc.low %vm215_vm12, %vm215_vm12  ;;  %v2313_v13 = vld [vmem:[#allocation8 + $0x60] sm:$0xff]   ;;  %v2314_v14 = vld [vmem:[#allocation8 + $0x90] sm:$0xff]  }
  0x9f   :  { %v1980_v50 = vcombine.low %v2872_v21, %v420_v46  ;;  %vm2915_vm1 = vmand %vm402_vm14, %vm394_vm2  ;;  %v382_v52 = vsel %vm378_vm15, 65537, %v2657_v0  ;;  %vm2923_vm3 = vcmp.ne.s16.totalorder %v1977_v47, 0  ;;  %v2315_v15 = vld [vmem:[#allocation8 + $0x20] sm:$0xff]   ;;  %2192 = vmatprep.subr.bf16.mxu1 %v2314_v14  ;;  %v2316_v16 = vld [vmem:[#allocation8 + $0x68] sm:$0xff]  }
  0xa0   :  { %vm2882_vm7 = vcmp.ne.s16.totalorder %v1979_v26, 0  ;;  %v404_v55 = vsel %vm2915_vm1, %v399_v49, 0  ;;  %v1978_v57 = vcombine.low %v382_v52, %v2872_v21  ;;  %v392_v58 = vsel %vm2923_vm3, 0, %v367_v53  ;;  %v2318_v18 = vld [vmem:[#allocation8 + $0x28] sm:$0xff]   ;;  %v2319_v19 = vld [vmem:[#allocation8 + $0x70] sm:$0xff]   ;;  %v2320_v20 = vld [vmem:[#allocation8 + $0xa0] sm:$0xff]  }
  0xa1   :  { %560 = vmatpush1.bf16.msra.mxu0 %v2294_v17  ;;  %v429_v29 = vsel %vm2882_vm7, 0, %v398_v25  ;;  %vm2929_vm4 = vcmp.ne.s16.totalorder %v1980_v50, 0  ;;  %2193 = vmatpush3.bf16.msra.mxu1 %v2314_v14  ;;  %v2317_v17 = vld [vmem:[#allocation8 + $0x98] sm:$0xff]   ;;  %v2321_v22 = vld [vmem:[#allocation8 + $0x30] sm:$0xff]   ;;  %vm2021_vm9 = vmneg %vm2923_vm3 }
  0xa2   :  { %561 = vmatprep.subr.bf16.mxu0 %v2657_v0  ;;  %1994 = vmatprep.mubr.msk.bf16.mxu0 %vm435_vm6, %v429_v29  ;;  %v430_v61 = vsel %vm2929_vm4, 0, %v404_v55  ;;  %vm2939_vm8 = vcmp.ne.s16.totalorder %v1978_v57, 0  ;;  %v2322_v23 = vld [vmem:[#allocation8 + $0x78] sm:$0xff]   ;;  %v2325_v26 = vld [vmem:[#allocation8 + $0xb0] sm:$0xff]   ;;  %vm2025_vm10 = vmneg %vm2882_vm7 }
  0xa3   :  { %v393_v7 = vsel %vm2939_vm8, 0, %v2879_v27  ;;  %2194 = vmatprep.subr.bf16.mxu1 %v2317_v17  ;;  %v2324_v25 = vld [vmem:[#allocation8 + $0x38] sm:$0xff]   ;;  %v2326_v27 = vld [vmem:[%s3142_s6] sm:$0xff]   ;;  %vm2023_vm11 = vmneg %vm2939_vm8 }
  0xa4   :  { %v2327_v29 = vld [vmem:[#allocation8 + $0xb8] sm:$0xff]   ;;  %vm2027_vm12 = vmneg %vm2929_vm4  ;;  %v2330_v14 = vld [vmem:[%s3142_s6 + $0x18] sm:$0xff]  }
  0xa5   :  { %562 = vmatpush1.bf16.msra.mxu0 %v2295_v24  ;;  %2195 = vmatpush3.bf16.msra.mxu1 %v2317_v17  ;;  %v2323_v24 = vld [vmem:[#allocation8 + $0xa8] sm:$0xff]   ;;  %v2329_v54 = vld [vmem:[%s3142_s6 + $0x10] sm:$0xff]  }
  0xa6   :  { %563 = vmatprep.subr.bf16.mxu0 %v2657_v0  ;;  %2196 = vmatprep.subr.bf16.mxu1 %v2320_v20  ;;  %v2333_v56 = vld [vmem:[#allocation14 + $0x4] ss:$8 sps:$4 sm:$0xff]   ;;  %v2334_v17 = vld [vmem:[#allocation14 + $0x10] ss:$8 sps:$4 sm:$0xff]  }
  0xa7   :  { %v2407_v48 = vld [vmem:[#allocation13 + $0x110] ss:$8 sps:$4 sm:$0xff]  }
  0xa9   :  { %564 = vmatpush1.bf16.msra.mxu0 %v2296_v30  ;;  %2197 = vmatpush3.bf16.msra.mxu1 %v2320_v20  ;;  %v1981_v30 = vld [vmem:[#allocation7] ss:$0 sm:$0xff]  ;;  %v2342_v20 = vld [vmem:[#allocation14 + $0x34] ss:$8 sps:$4 sm:$0xff]  }
  0xaa   :  { %565 = vmatprep.subr.bf16.mxu0 %v2657_v0  ;;  %2198 = vmatprep.subr.bf16.mxu1 %v2323_v24 }
  0xad   :  { %566 = vmatpush1.bf16.msra.mxu0 %v2297_v32  ;;  %2199 = vmatpush3.bf16.msra.mxu1 %v2323_v24  ;;  %v2348_v24 = vld [vmem:[#allocation14 + $0x54] ss:$8 sps:$4 sm:$0xff]  }
  0xae   :  { %567 = vmatprep.subr.bf16.mxu0 %v2657_v0  ;;  %2200 = vmatprep.subr.bf16.mxu1 %v2325_v26 }
  0xb1   :  { %568 = vmatpush1.bf16.msra.mxu0 %v2298_v34  ;;  %2201 = vmatpush3.bf16.msra.mxu1 %v2325_v26  ;;  %v2349_v26 = vld [vmem:[#allocation14 + $0x60] ss:$8 sps:$4 sm:$0xff]  }
  0xb2   :  { %569 = vmatprep.subr.bf16.mxu0 %v2657_v0  ;;  %2202 = vmatprep.subr.bf16.mxu1 %v2327_v29 }
  0xb5   :  { %570 = vmatpush1.bf16.msra.mxu0 %v2299_v35  ;;  %2203 = vmatpush3.bf16.msra.mxu1 %v2327_v29  ;;  %v2352_v29 = vld [vmem:[#allocation14 + $0x70] ss:$8 sps:$4 sm:$0xff]  }
  0xb6   :  { %571 = vmatprep.subr.bf16.mxu0 %v2657_v0 }
  0xb9   :  { %572 = vmatpush1.bf16.msra.mxu0 %v2300_v36 }
  0xba   :  { %573 = vmatprep.subr.bf16.mxu0 %v2657_v0 }
  0xbd   :  { %574 = vmatpush1.bf16.msra.mxu0 %v2301_v37 }
  0xbe   :  { %575 = vmatprep.subr.bf16.mxu0 %v2657_v0 }
  0xc1   :  { %576 = vmatpush1.bf16.msra.mxu0 %v2302_v38 }
  0xc2   :  { %2144 = vmatprep.subr.bf16.mxu0 %v2303_v39 }
 0x106   :  { %v432_v60 = vpop.permute.xlu0 %431 }
 0x107   :  { %v438_v63 = vsel %vm435_vm6, %v392_v58, %v432_v60 }
 0x108   :  { %586 = vmatmul.mubr.bf16.vlgmr.msra.gmra.mrb[0].mxu0 %v438_v63 }
 0x109   :  { %1995 = vmatprep.mubr.msk.bf16.mxu0 %vm435_vm6, %v430_v61  ;;  %2145 = vmatpush3.bf16.msra.mxu0 %v2304_v59  ;;  %v2328_v61 = vld [vmem:[%s3142_s6 + $0x8] sm:$0xff]  }
 0x10a   :  { %v434_v6 = vpop.permute.xlu0 %433  ;;  %2146 = vmatprep.subr.bf16.mxu0 %v2305_v62 }
 0x10b   :  { %v442_v9 = vsel %vm435_vm6, %v393_v7, %v434_v6 }
 0x10d   :  { %2147 = vmatpush3.bf16.msra.mxu0 %v2306_v5 }
 0x10e   :  { %2148 = vmatprep.subr.bf16.mxu0 %v2307_v8 }
 0x110   :  { %594 = vmatmul.mubr.bf16.gmra.mrb[4].mxu0 %v442_v9 }
 0x111   :  { %2149 = vmatpush3.bf16.msra.mxu0 %v2309_v10 }
 0x112   :  { %2150 = vmatprep.subr.bf16.mxu0 %v2310_v11 }
 0x115   :  { %2151 = vmatpush3.bf16.msra.mxu0 %v2312_v12 }
 0x116   :  { %2152 = vmatprep.subr.bf16.mxu0 %v2313_v13 }
 0x119   :  { %2153 = vmatpush3.bf16.msra.mxu0 %v2315_v15  ;;  %v2331_v15 = vld [vmem:[#allocation14] ss:$8 sps:$4 sm:$0xff]  }
 0x11a   :  { %2154 = vmatprep.subr.bf16.mxu0 %v2316_v16  ;;  %v2336_v16 = vld [vmem:[#allocation14 + $0x14] ss:$8 sps:$4 sm:$0xff]  }
 0x11d   :  { %2155 = vmatpush3.bf16.msra.mxu0 %v2318_v18  ;;  %v2339_v18 = vld [vmem:[#allocation14 + $0x24] ss:$8 sps:$4 sm:$0xff]  }
 0x11e   :  { %2156 = vmatprep.subr.bf16.mxu0 %v2319_v19  ;;  %v2337_v19 = vld [vmem:[#allocation14 + $0x20] ss:$8 sps:$4 sm:$0xff]  }
 0x121   :  { %2157 = vmatpush3.bf16.msra.mxu0 %v2321_v22  ;;  %v2345_v22 = vld [vmem:[#allocation14 + $0x44] ss:$8 sps:$4 sm:$0xff]  }
 0x122   :  { %2158 = vmatprep.subr.bf16.mxu0 %v2322_v23  ;;  %v2343_v23 = vld [vmem:[#allocation14 + $0x40] ss:$8 sps:$4 sm:$0xff]  }
 0x125   :  { %2159 = vmatpush3.bf16.msra.mxu0 %v2324_v25  ;;  %v2351_v25 = vld [vmem:[#allocation14 + $0x64] ss:$8 sps:$4 sm:$0xff]  }
 0x126   :  { %2208 = vmatprep.subr.bf16.mxu0 %v2326_v27 }
 0x1db   :  { %v587_v31 = vpop.f32.mrb[0].mxu0 }
 0x1dc   :  { %v588_v32 = vadd.f32 %v1981_v30, %v587_v31  ;;  %v589_v33 = vpop.f32.mrb[1].mxu0  ;;  %v2357_v31 = vld [vmem:[#allocation13 + $0x4] ss:$8 sps:$4 sm:$0xff]  }
 0x1dd   :  { %v590_v34 = vpop.f32.mrb[2].mxu0  ;;  %1686 = vmatprep.subr.bf16.mxu1 %v2357_v31  ;;  %v2358_v33 = vld [vmem:[#allocation13 + $0x10] ss:$8 sps:$4 sm:$0xff]  }
 0x1de   :  { %v602_v35 = vmul.f32 0.2, %v588_v32  ;;  %v591_v36 = vadd.f32 %v1981_v30, %v590_v34  ;;  %v592_v37 = vpop.f32.mrb[3].mxu0  ;;  %v2363_v34 = vld [vmem:[#allocation13 + $0x24] ss:$8 sps:$4 sm:$0xff]  }
 0x1df   :  { %v2982_v37 = vld [vmem:[%s3137_s1] sm:$0xff]  }
 0x1e0   :  { %v603_v38 = vmul.f32 0.2, %v591_v36  ;;  %v606_v39 = vmax.f32 %v588_v32, %v602_v35  ;;  %v2360_v32 = vld [vmem:[#allocation13 + $0x14] ss:$8 sps:$4 sm:$0xff]   ;;  %v2361_v35 = vld [vmem:[#allocation13 + $0x20] ss:$8 sps:$4 sm:$0xff]  }
 0x1e2   :  { %v607_v41 = vmax.f32 %v591_v36, %v603_v38  ;;  %v2366_v36 = vld [vmem:[#allocation13 + $0x34] ss:$8 sps:$4 sm:$0xff]   ;;  %v2364_v38 = vld [vmem:[#allocation13 + $0x30] ss:$8 sps:$4 sm:$0xff]  }
 0x1e3   :  { %v595_v42 = vpop.f32.mrb[4].mxu0 }
 0x1e4   :  { %v596_v43 = vadd.f32 %v1981_v30, %v595_v42  ;;  %v597_v44 = vpop.f32.mrb[5].mxu0  ;;  %v610_v45 = vpack.c.bf16 %v607_v41, %v606_v39  ;;  %v2369_v39 = vld [vmem:[#allocation13 + $0x44] ss:$8 sps:$4 sm:$0xff]   ;;  %v2367_v41 = vld [vmem:[#allocation13 + $0x40] ss:$8 sps:$4 sm:$0xff]  }
 0x1e5   :  { %v598_v46 = vpop.f32.mrb[6].mxu0  ;;  %v2372_v42 = vld [vmem:[#allocation13 + $0x54] ss:$8 sps:$4 sm:$0xff]   ;;  %v2375_v44 = vld [vmem:[#allocation13 + $0x64] ss:$8 sps:$4 sm:$0xff]  }
 0x1e6   :  { %v604_v47 = vmul.f32 0.2, %v596_v43  ;;  %v599_v49 = vadd.f32 %v1981_v30, %v598_v46  ;;  %v600_v50 = vpop.f32.mrb[7].mxu0  ;;  %v613_v52 = vshrl.u32 %v610_v45, 16  ;;  %873 = vmatprep.mubr.bf16.mxu0 %v610_v45  ;;  %v616_v57 = vshll.u32 %v610_v45, 16 }
 0x1e7   :  { %v2355_v30 = vld [vmem:[#allocation13] ss:$8 sps:$4 sm:$0xff]   ;;  %v2378_v46 = vld [vmem:[#allocation13 + $0x74] ss:$8 sps:$4 sm:$0xff]  }
 0x1e8   :  { %v605_v53 = vmul.f32 0.2, %v599_v49  ;;  %v615_v55 = vrot.slane %v613_v52, 7  ;;  %v608_v58 = vmax.f32 %v596_v43, %v604_v47  ;;  %v632_v5 = vrot.slane %v616_v57, 1  ;;  %v2370_v43 = vld [vmem:[#allocation13 + $0x50] ss:$8 sps:$4 sm:$0xff]  }
 0x1e9   :  { %v2373_v45 = vld [vmem:[#allocation13 + $0x60] ss:$8 sps:$4 sm:$0xff]   ;;  %v2376_v47 = vld [vmem:[#allocation13 + $0x70] ss:$8 sps:$4 sm:$0xff]  }
 0x1ea   :  { %v609_v59 = vmax.f32 %v599_v49, %v605_v53  ;;  %v618_v60 = vor.u32 %v616_v57, %v615_v55  ;;  %v633_v8 = vor.u32 %v632_v5, %v613_v52  ;;  %v2381_v49 = vld [vmem:[#allocation13 + $0x84] ss:$8 sps:$4 sm:$0xff]   ;;  %v2379_v50 = vld [vmem:[#allocation13 + $0x80] ss:$8 sps:$4 sm:$0xff]   ;;  %v2384_v52 = vld [vmem:[#allocation13 + $0x94] ss:$8 sps:$4 sm:$0xff]  }
 0x1eb   :  { %v2382_v53 = vld [vmem:[#allocation13 + $0x90] ss:$8 sps:$4 sm:$0xff]   ;;  %v2385_v57 = vld [vmem:[#allocation13 + $0xa0] ss:$8 sps:$4 sm:$0xff]  }
 0x1ec   :  { %v629_v62 = vsel %vm2906_vm0, 0, %v618_v60  ;;  %v611_v63 = vpack.c.bf16 %v609_v59, %v608_v58  ;;  %v2390_v58 = vld [vmem:[#allocation13 + $0xb4] ss:$8 sps:$4 sm:$0xff]   ;;  %v2388_v59 = vld [vmem:[#allocation13 + $0xb0] ss:$8 sps:$4 sm:$0xff]  }
 0x1ed   :  { %2022 = vmatmul.mubr.msk.bf16.vlgmr.msra.gmra.mrb[8].mxu0 %vm2021_vm9, %v629_v62  ;;  %v2393_v60 = vld [vmem:[#allocation13 + $0xc4] ss:$8 sps:$4 sm:$0xff]   ;;  %v2391_v62 = vld [vmem:[#allocation13 + $0xc0] ss:$8 sps:$4 sm:$0xff]   ;;  %v2394_v5 = vld [vmem:[#allocation13 + $0xd0] ss:$8 sps:$4 sm:$0xff]  }
 0x1ee   :  { %v620_v6 = vshrl.u32 %v611_v63, 16  ;;  %881 = vmatprep.mubr.bf16.mxu0 %v611_v63  ;;  %2209 = vmatpush3.bf16.msra.mxu0 %v2326_v27  ;;  %v623_v7 = vshll.u32 %v611_v63, 16  ;;  %v2354_v27 = vld [vmem:[#allocation14 + $0x74] ss:$8 sps:$4 sm:$0xff]  }
 0x1ef   :  { %2210 = vmatprep.subr.bf16.mxu0 %v2328_v61  ;;  %v2396_v63 = vld [vmem:[#allocation13 + $0xd4] ss:$8 sps:$4 sm:$0xff]  }
 0x1f0   :  { %v634_v9 = vrot.slane %v623_v7, 1  ;;  %v622_v10 = vrot.slane %v620_v6, 7 }
 0x1f2   :  { %2211 = vmatpush3.bf16.msra.mxu0 %v2328_v61  ;;  %v635_v11 = vsel %vm394_vm2, %v633_v8, %v634_v9  ;;  %v625_v12 = vor.u32 %v623_v7, %v622_v10  ;;  %v636_v13 = vor.u32 %v634_v9, %v620_v6  ;;  %v229_v61 = vand.u32 31, %v2847_v2  ;;  %v2399_v7 = vld [vmem:[#allocation13 + $0xe4] ss:$8 sps:$4 sm:$0xff]   ;;  %v2993_v10 = vld [vmem:[%s3137_s1 + $0x8] sm:$0xff]  }
 0x1f3   :  { %2204 = vmatprep.mubr.msk.bf16.mxu1 %vm2025_vm10, %v635_v11  ;;  %2212 = vmatprep.subr.bf16.mxu0 %v2329_v54  ;;  %v1227_v6 = vshrl.u32 %v2982_v37, 16  ;;  %v1230_v8 = vshll.u32 %v2982_v37, 16  ;;  %v2402_v11 = vld [vmem:[#allocation13 + $0xf4] ss:$8 sps:$4 sm:$0xff]  }
 0x1f4   :  { %v626_v28 = vsel %vm347_vm5, %v615_v55, %v625_v12  ;;  %v639_v1 = vsel %vm2915_vm1, %v636_v13, 0  ;;  %v2387_v55 = vld [vmem:[#allocation13 + $0xa4] ss:$8 sps:$4 sm:$0xff]   ;;  %v221_v13 = vadd.s32 32, %v2847_v2 }
 0x1f5   :  { %2024 = vmatmul.mubr.msk.bf16.gmra.mrb[12].mxu0 %vm2023_vm11, %v626_v28  ;;  %2205 = vmatmul.mubr.msk.bf16.vlgmr.msra.gmra.mrb[0].mxu1 %vm2027_vm12, %v639_v1  ;;  %v1229_v9 = vrot.slane %v1227_v6, 7 }
 0x1f6   :  { %2213 = vmatpush3.bf16.msra.mxu0 %v2329_v54  ;;  %2216 = vmatprep.mubr.msk.bf16.mxu0 %vm435_vm6, %v2849_v3  ;;  %v2340_v3 = vld [vmem:[#allocation14 + $0x30] ss:$8 sps:$4 sm:$0xff]   ;;  %v2397_v54 = vld [vmem:[#allocation13 + $0xe0] ss:$8 sps:$4 sm:$0xff]  }
 0x1f7   :  { %2214 = vmatprep.subr.bf16.mxu0 %v2330_v14  ;;  %1687 = vmatpush1.bf16.msra.mxu1 %v2355_v30  ;;  %v1232_v28 = vor.u32 %v1230_v8, %v1229_v9  ;;  %v2411_v30 = vld [vmem:[#allocation13 + $0x120] ss:$8 sps:$4 sm:$0xff]  }
 0x1f8   :  { %1688 = vmatprep.subr.bf16.mxu1 %v2360_v32  ;;  %1718 = vmatprep.mubr.bf16.mxu1 %v2982_v37  ;;  %v1996_v37 = vld [vmem:[#allocation10] ss:$0 sm:$0xff] }
 0x1fa   :  { %2215 = vmatpush3.bf16.msra.mxu0 %v2330_v14  ;;  %v2400_v14 = vld [vmem:[#allocation13 + $0xf0] ss:$8 sps:$4 sm:$0xff]  }
 0x1fb   :  { %1141 = vmatprep.subr.bf16.mxu0 %v2333_v56  ;;  %1689 = vmatpush1.bf16.msra.mxu1 %v2358_v33  ;;  %v1234_v56 = vshrl.u32 %v2993_v10, 16  ;;  %v3033_v33 = vld [vmem:[%s3137_s1 + $0x18] sm:$0xff]  }
 0x1fc   :  { %1690 = vmatprep.subr.bf16.mxu1 %v2363_v34  ;;  %v2416_v34 = vld [vmem:[#allocation13 + $0x134] ss:$8 sps:$4 sm:$0xff]  }
 0x1fd   :  { %2217 = vmatmul.mubr.msk.bf16.vlgmr.msra.gmra.mrb[16].mxu0 %vm435_vm6, %v2851_v4  ;;  %v2346_v4 = vld [vmem:[#allocation14 + $0x50] ss:$8 sps:$4 sm:$0xff]   ;;  %vm321_vm6 = vcmp.eq.s32.totalorder %v229_v61, 0 }
 0x1fe   :  { %1142 = vmatpush1.bf16.msra.mxu0 %v2331_v15  ;;  %1173 = vmatprep.mubr.bf16.mxu0 %v2657_v0  ;;  %vm1278_vm7 = vmpackc.low %vm321_vm6, %vm321_vm6  ;;  %v2406_v15 = vld [vmem:[#allocation13 + $0x104] ss:$8 sps:$4 sm:$0xff]  }
 0x1ff   :  { %1143 = vmatprep.subr.bf16.mxu0 %v2336_v16  ;;  %1691 = vmatpush1.bf16.msra.mxu1 %v2361_v35  ;;  %v1286_v12 = vsel %vm1278_vm7, 65537, %v2657_v0  ;;  %v2404_v16 = vld [vmem:[#allocation13 + $0x100] ss:$8 sps:$4 sm:$0xff]  }
 0x200   :  { %1692 = vmatprep.subr.bf16.mxu1 %v2366_v36  ;;  %v2056_v1 = vcombine.low %v1286_v12, %v2872_v21  ;;  %v2414_v36 = vld [vmem:[#allocation13 + $0x130] ss:$8 sps:$4 sm:$0xff]  }
 0x202   :  { %1144 = vmatpush1.bf16.msra.mxu0 %v2334_v17  ;;  %v257_v17 = vand.u32 31, %v221_v13  ;;  %vm2136_vm13 = vcmp.eq.s16.totalorder %v2056_v1, 0 }
 0x203   :  { %1145 = vmatprep.subr.bf16.mxu0 %v2339_v18  ;;  %1693 = vmatpush1.bf16.msra.mxu1 %v2364_v38  ;;  %v1261_v18 = vsel %vm2906_vm0, 0, %v1232_v28 }
 0x204   :  { %1694 = vmatprep.subr.bf16.mxu1 %v2369_v39  ;;  %vm3011_vm14 = vcmp.eq.s32.totalorder %v257_v17, 0 }
 0x205   :  { %vm1282_vm15 = vmpackc.low %vm3011_vm14, %vm3011_vm14 }
 0x206   :  { %1146 = vmatpush1.bf16.msra.mxu0 %v2337_v19  ;;  %v1237_v19 = vshll.u32 %v2993_v10, 16  ;;  %v1290_v35 = vsel %vm1282_vm15, 65537, %v2657_v0 }
 0x207   :  { %1147 = vmatprep.subr.bf16.mxu0 %v2342_v20  ;;  %1695 = vmatpush1.bf16.msra.mxu1 %v2367_v41  ;;  %v3009_v20 = vld [vmem:[%s3137_s1 + $0x10] sm:$0xff]   ;;  %v2058_v39 = vcombine.low %v1290_v35, %v2872_v21  ;;  %v1250_v41 = vshrl.u32 %v3033_v33, 16 }
 0x208   :  { %1696 = vmatprep.subr.bf16.mxu1 %v2372_v42  ;;  %v1245_v31 = vshll.u32 %v3009_v20, 16  ;;  %v2420_v42 = vld [vmem:[#allocation13 + $0x144] ss:$8 sps:$4 sm:$0xff]   ;;  %v1316_v61 = vrot.slane %v1237_v19, 1 }
 0x209   :  { %vm2138_vm3 = vcmp.eq.s16.totalorder %v2058_v39, 0 }
 0x20a   :  { %1148 = vmatpush1.bf16.msra.mxu0 %v2340_v3  ;;  %v1236_v3 = vrot.slane %v1234_v56, 7  ;;  %v1319_v12 = vrot.slane %v1245_v31, 1 }
 0x20b   :  { %1149 = vmatprep.subr.bf16.mxu0 %v2345_v22  ;;  %1697 = vmatpush1.bf16.msra.mxu1 %v2370_v43  ;;  %v2409_v22 = vld [vmem:[#allocation13 + $0x114] ss:$8 sps:$4 sm:$0xff]  }
 0x20c   :  { %1698 = vmatprep.subr.bf16.mxu1 %v2375_v44  ;;  %v2418_v44 = vld [vmem:[#allocation13 + $0x140] ss:$8 sps:$4 sm:$0xff]  }
 0x20e   :  { %1150 = vmatpush1.bf16.msra.mxu0 %v2343_v23 }
 0x20f   :  { %1151 = vmatprep.subr.bf16.mxu0 %v2348_v24  ;;  %1699 = vmatpush1.bf16.msra.mxu1 %v2373_v45  ;;  %v1239_v24 = vor.u32 %v1237_v19, %v1236_v3  ;;  %v1253_v45 = vshll.u32 %v3033_v33, 16 }
 0x210   :  { %1700 = vmatprep.subr.bf16.mxu1 %v2378_v46  ;;  %v1252_v46 = vrot.slane %v1250_v41, 7 }
 0x212   :  { %1152 = vmatpush1.bf16.msra.mxu0 %v2346_v4  ;;  %v2057_v4 = vcombine.low %v2872_v21, %v2872_v21 }
 0x213   :  { %1153 = vmatprep.subr.bf16.mxu0 %v2351_v25  ;;  %1701 = vmatpush1.bf16.msra.mxu1 %v2376_v47  ;;  %v1242_v25 = vshrl.u32 %v3009_v20, 16  ;;  %v2423_v47 = vld [vmem:[#allocation13 + $0x154] ss:$8 sps:$4 sm:$0xff]  }
 0x214   :  { %1702 = vmatprep.subr.bf16.mxu1 %v2381_v49  ;;  %vm3023_vm0 = vcmp.eq.s16.totalorder %v2057_v4, 0  ;;  %v2421_v49 = vld [vmem:[#allocation13 + $0x150] ss:$8 sps:$4 sm:$0xff]  }
 0x215   :  { %v1244_v32 = vrot.slane %v1242_v25, 7 }
 0x216   :  { %1154 = vmatpush1.bf16.msra.mxu0 %v2349_v26  ;;  %v2413_v26 = vld [vmem:[#allocation13 + $0x124] ss:$8 sps:$4 sm:$0xff]  }
 0x217   :  { %1155 = vmatprep.subr.bf16.mxu0 %v2354_v27  ;;  %1703 = vmatpush1.bf16.msra.mxu1 %v2379_v50  ;;  %v1240_v27 = vsel %vm347_vm5, %v1229_v9, %v1239_v24  ;;  %v1247_v38 = vor.u32 %v1245_v31, %v1244_v32  ;;  %v1255_v50 = vor.u32 %v1253_v45, %v1252_v46 }
 0x218   :  { %1704 = vmatprep.subr.bf16.mxu1 %v2384_v52  ;;  %v2427_v52 = vld [vmem:[#allocation13 + $0x164] ss:$8 sps:$4 sm:$0xff]  }
 0x219   :  { %v1248_v43 = vsel %vm347_vm5, %v1236_v3, %v1247_v38 }
 0x21a   :  { %1156 = vmatpush1.bf16.msra.mxu0 %v2352_v29 }
 0x21b   :  { %1705 = vmatpush1.bf16.msra.mxu1 %v2382_v53  ;;  %v250_v53 = vand.u32 31, %v2897_v40 }
 0x21c   :  { %1706 = vmatprep.subr.bf16.mxu1 %v2387_v55  ;;  %v1314_v55 = vrot.slane %v1230_v8, 1 }
 0x21d   :  { %vm332_vm4 = vcmp.eq.s32.totalorder %v250_v53, 31 }
 0x21e   :  { %vm1349_vm8 = vmpackc.low %vm332_vm4, %vm332_vm4 }
 0x21f   :  { %1707 = vmatpush1.bf16.msra.mxu1 %v2385_v57  ;;  %v1256_v57 = vsel %vm347_vm5, %v1244_v32, %v1255_v50  ;;  %v1357_v8 = vsel %vm1349_vm8, 65537, %v2657_v0 }
 0x220   :  { %1708 = vmatprep.subr.bf16.mxu1 %v2390_v58  ;;  %v2425_v58 = vld [vmem:[#allocation13 + $0x160] ss:$8 sps:$4 sm:$0xff]   ;;  %v2061_v13 = vcombine.low %v2872_v21, %v1357_v8 }
 0x222   :  { %vm2141_vm5 = vcmp.eq.s16.totalorder %v2061_v13, 0 }
 0x223   :  { %1709 = vmatpush1.bf16.msra.mxu1 %v2388_v59  ;;  %v2430_v59 = vld [vmem:[#allocation13 + $0x174] ss:$8 sps:$4 sm:$0xff]  }
 0x224   :  { %1710 = vmatprep.subr.bf16.mxu1 %v2393_v60  ;;  %v1315_v60 = vor.u32 %v1314_v55, %v1227_v6  ;;  %v1318_v6 = vor.u32 %v1316_v61, %v1234_v56 }
 0x226   :  { %v1320_v17 = vsel %vm394_vm2, %v1318_v6, %v1319_v12 }
 0x227   :  { %1711 = vmatpush1.bf16.msra.mxu1 %v2391_v62  ;;  %v2428_v62 = vld [vmem:[#allocation13 + $0x170] ss:$8 sps:$4 sm:$0xff]  }
 0x228   :  { %1712 = vmatprep.subr.bf16.mxu1 %v2396_v63 }
 0x22b   :  { %1713 = vmatpush1.bf16.msra.mxu1 %v2394_v5  ;;  %v1317_v5 = vsel %vm394_vm2, %v1315_v60, %v1316_v61 }
 0x22c   :  { %1714 = vmatprep.subr.bf16.mxu1 %v2399_v7 }
 0x22f   :  { %1715 = vmatpush1.bf16.msra.mxu1 %v2397_v54 }
 0x230   :  { %1716 = vmatprep.subr.bf16.mxu1 %v2402_v11 }
 0x233   :  { %1717 = vmatpush1.bf16.msra.mxu1 %v2400_v14 }
 0x234   :  { %1759 = vmatprep.subr.bf16.mxu1 %v2406_v15 }
 0x236   :  { %2113 = vmatmul.mubr.msk.bf16.vlgmr.msra.gmra.mrb[4].mxu1 %vm2136_vm13, %v1261_v18 }
 0x237   :  { %1760 = vmatpush1.bf16.msra.mxu1 %v2404_v16  ;;  %1728 = vmatprep.mubr.bf16.mxu1 %v2993_v10 }
 0x238   :  { %1761 = vmatprep.subr.bf16.mxu1 %v2409_v22 }
 0x23b   :  { %1762 = vmatpush1.bf16.msra.mxu1 %v2407_v48 }
 0x23c   :  { %1763 = vmatprep.subr.bf16.mxu1 %v2413_v26  ;;  %v1321_v26 = vor.u32 %v1319_v12, %v1242_v25 }
 0x23e   :  { %2115 = vmatmul.mubr.msk.bf16.gmra.mrb[8].mxu1 %vm3023_vm0, %v1240_v27  ;;  %v1322_v27 = vrot.slane %v1253_v45, 1 }
 0x23f   :  { %1764 = vmatpush1.bf16.msra.mxu1 %v2411_v30  ;;  %1738 = vmatprep.mubr.bf16.mxu1 %v3009_v20 }
 0x240   :  { %1765 = vmatprep.subr.bf16.mxu1 %v2416_v34  ;;  %v2029_v34 = vld [vmem:[#allocation11] ss:$0 sm:$0xff] }
 0x243   :  { %1766 = vmatpush1.bf16.msra.mxu1 %v2414_v36 }
 0x244   :  { %1767 = vmatprep.subr.bf16.mxu1 %v2420_v42 }
 0x246   :  { %2117 = vmatmul.mubr.msk.bf16.gmra.mrb[12].mxu1 %vm2138_vm3, %v1248_v43 }
 0x247   :  { %1768 = vmatpush1.bf16.msra.mxu1 %v2418_v44  ;;  %1748 = vmatprep.mubr.bf16.mxu1 %v3033_v33  ;;  %v1323_v44 = vsel %vm394_vm2, %v1321_v26, %v1322_v27  ;;  %v2434_v26 = vld [vmem:[%s3146_s10 + $0x10] sm:$0xff]  }
 0x248   :  { %1769 = vmatprep.subr.bf16.mxu1 %v2423_v47 }
 0x24b   :  { %1770 = vmatpush1.bf16.msra.mxu1 %v2421_v49 }
 0x24c   :  { %1771 = vmatprep.subr.bf16.mxu1 %v2427_v52 }
 0x24e   :  { %2119 = vmatmul.mubr.msk.bf16.gmra.mrb[16].mxu1 %vm3023_vm0, %v1256_v57 }
 0x24f   :  { %1772 = vmatpush1.bf16.msra.mxu1 %v2425_v58  ;;  %1791 = vmatprep.mubr.bf16.mxu1 %v2657_v0 }
 0x250   :  { %1773 = vmatprep.subr.bf16.mxu1 %v2430_v59 }
 0x253   :  { %1774 = vmatpush1.bf16.msra.mxu1 %v2428_v62 }
 0x256   :  { %2121 = vmatmul.mubr.msk.bf16.vlgmr.msra.gmra.mrb[4].mxu1 %vm3023_vm0, %v1317_v5  ;;  %v1324_v5 = vor.u32 %v1322_v27, %v1250_v41  ;;  %v1438_v27 = vsub.s32 0, %v2847_v2 }
 0x257   :  { %1801 = vmatprep.mubr.bf16.mxu1 %v2657_v0 }
 0x25e   :  { %2123 = vmatmul.mubr.msk.bf16.gmra.mrb[8].mxu1 %vm2141_vm5, %v1320_v17 }
 0x25f   :  { %1811 = vmatprep.mubr.bf16.mxu1 %v2657_v0 }
 0x266   :  { %2125 = vmatmul.mubr.msk.bf16.gmra.mrb[12].mxu1 %vm3023_vm0, %v1323_v44 }
 0x267   :  { %1821 = vmatprep.mubr.bf16.mxu1 %v2657_v0 }
 0x2c0   :  { %v2160_v40 = vpop.f32.mrb[8].mxu0 }
 0x2c1   :  { %v2161_v63 = vpop.f32.mrb[9].mxu0 }
 0x2c2   :  { %v2162_v7 = vadd.f32 %v2161_v63, %v2160_v40  ;;  %v2163_v54 = vpop.f32.mrb[10].mxu0  ;;  %v224_v40 = vadd.s32 56, %v2847_v2 }
 0x2c3   :  { %v2164_v9 = vpop.f32.mrb[11].mxu0 }
 0x2c4   :  { %v2165_v11 = vadd.f32 %v2164_v9, %v2163_v54  ;;  %v876_v1 = vadd.f32 %v2162_v7, %v1996_v37  ;;  %v278_v63 = vand.u32 31, %v224_v40  ;;  %v1329_v54 = vsel %vm2915_vm1, %v1324_v5, 0 }
 0x2c5   :  { %vm1852_vm1 = vcmask 261120  }
 0x2c6   :  { %v879_v23 = vadd.f32 %v2165_v11, %v1996_v37  ;;  %vm336_vm2 = vcmp.eq.s32.totalorder %v278_v63, 31 }
 0x2c7   :  { %vm1353_vm9 = vmpackc.low %vm336_vm2, %vm336_vm2 }
 0x2c8   :  { %v2166_v14 = vpop.f32.mrb[12].mxu0  ;;  %v2206_v28 = vpop.f32.mrb[0].mxu1  ;;  %v1361_v29 = vsel %vm1353_vm9, 65537, %v2657_v0 }
 0x2c9   :  { %v2167_v15 = vpop.f32.mrb[13].mxu0  ;;  %v924_v16 = vpop.f32.mrb[1].mxu1  ;;  %v2063_v7 = vcombine.low %v2872_v21, %v1361_v29 }
 0x2ca   :  { %v2168_v18 = vadd.f32 %v2167_v15, %v2166_v14  ;;  %v925_v19 = vadd.f32 %v924_v16, %v876_v1  ;;  %v2169_v3 = vpop.f32.mrb[14].mxu0  ;;  %v2207_v22 = vpop.f32.mrb[2].mxu1 }
 0x2cb   :  { %v2170_v48 = vpop.f32.mrb[15].mxu0  ;;  %v927_v24 = vpop.f32.mrb[3].mxu1  ;;  %vm2143_vm10 = vcmp.eq.s16.totalorder %v2063_v7, 0 }
 0x2cc   :  { %v884_v10 = vadd.f32 %v2168_v18, %v1996_v37  ;;  %v2171_v56 = vadd.f32 %v2170_v48, %v2169_v3  ;;  %v928_v4 = vadd.f32 %v927_v24, %v879_v23  ;;  %v939_v31 = vmul.f32 0.2, %v925_v19  ;;  %2127 = vmatmul.mubr.msk.bf16.gmra.mrb[16].mxu1 %vm2143_vm10, %v1329_v54 }
 0x2cd   :  { %1927 = vmatprep.mubr.bf16.mxu1 %v2657_v0 }
 0x2ce   :  { %v933_v30 = vadd.f32 %v2206_v28, %v884_v10  ;;  %v887_v32 = vadd.f32 %v2171_v56, %v1996_v37  ;;  %v940_v35 = vmul.f32 0.2, %v928_v4  ;;  %v943_v46 = vmax.f32 %v925_v19, %v939_v31  ;;  %v2431_v10 = vld [vmem:[%s3146_s10] sm:$0xff]   ;;  %v2432_v56 = vld [vmem:[%s3146_s10 + $0x18] sm:$0xff]  }
 0x2cf   :  { %v1442_v31 = vsub.s32 1, %v2847_v2 }
 0x2d0   :  { %v936_v36 = vadd.f32 %v2207_v22, %v887_v32  ;;  %v941_v38 = vmul.f32 0.2, %v933_v30  ;;  %v2218_v39 = vpop.f32.mrb[16].mxu0  ;;  %v944_v20 = vmax.f32 %v928_v4, %v940_v35  ;;  %v2433_v4 = vld [vmem:[%s3146_s10 + $0x8] sm:$0xff]  }
 0x2d1   :  { %v1033_v42 = vadd.f32 %v2218_v39, %v2029_v34  ;;  %v1024_v43 = vpop.f32.mrb[17].mxu0 }
 0x2d2   :  { %v945_v47 = vmax.f32 %v933_v30, %v941_v38  ;;  %v1025_v49 = vadd.f32 %v2029_v34, %v1024_v43  ;;  %v942_v50 = vmul.f32 0.2, %v936_v36  ;;  %v2219_v52 = vpop.f32.mrb[18].mxu0  ;;  %v1434_v30 = vld [vmem:[%s3145_s9] sm:$0x3]  ;;  %s2659_s9 = smov [#allocation16]  }
 0x2d3   :  { %v1036_v25 = vadd.f32 %v2219_v52, %v2029_v34  ;;  %v1027_v45 = vpop.f32.mrb[19].mxu0  ;;  %v1439_v32 = vrot.slane %v1434_v30, %v1438_v27  ;;  %s1959_s10 = sshll.u32 %s2659_s9, 4  ;;  %s1960_s10 = int_to_ptr.vmem [resolvable:$true] %s1959_s10 }
 0x2d4   :  { %v1041_v53 = vadd.f32 %v1033_v42, %v945_v47  ;;  %v1039_v55 = vadd.f32 %v1025_v49, %v943_v46  ;;  %v946_v57 = vmax.f32 %v936_v36, %v942_v50  ;;  %v1028_v58 = vadd.f32 %v2029_v34, %v1027_v45  ;;  %s2611_s8 = scalar_lea.vmem %s1960_s10, 2048  ;;  %p2616_p9 = scmp.lt.s32.totalorder %s1960_s10, %s1960_s10 }
 0x2d5   :  { %v1443_v34 = vrot.slane %v1434_v30, %v1442_v31  ;;  %p2612_p8 = scmp.ne.s32.totalorder %s1960_s10, %s2611_s8  ;;  %p2617_p10 = scmp.lt.s32.totalorder %s2611_s8, %s2611_s8 }
 0x2d6   :  { %v1042_v59 = vadd.f32 %v1036_v25, %v946_v57  ;;  %v1040_v60 = vadd.f32 %v1028_v58, %v944_v20 }
 0x2d7   :  { %p2618_p11 = por %p2617_p10, %p2616_p9 }
 0x2d8   :  { %v1043_v61 = vpack.c.bf16 %v1040_v60, %v1039_v55  ;;  %v1044_v62 = vpack.c.bf16 %v1042_v59, %v1041_v53 }
 0x2d9   :  { %p2619_p12 = pnand %p2618_p11, %p2612_p8 }
 0x2da   :  { %1174 = vmatmul.mubr.bf16.vlgmr.msra.gmra.mrb[20].mxu0 %v1043_v61 }
 0x2db   :  { %1183 = vmatprep.mubr.bf16.mxu0 %v2657_v0 }
 0x2e2   :  { %1184 = vmatmul.mubr.bf16.gmra.mrb[24].mxu0 %v1044_v62 }
 0x2e3   :  { %1897 = vmatprep.mubr.bf16.mxu0 %v2657_v0 }
 0x329   :  { %v1793_v8 = vpop.f32.mrb[4].mxu1 }
 0x32a   :  { %v1795_v9 = vpop.f32.mrb[5].mxu1  ;;  %v2224_v35 = vadd.f32 %v1793_v8, %v1439_v32 }
 0x32b   :  { %v1797_v11 = vpop.f32.mrb[6].mxu1  ;;  %v2226_v36 = vadd.f32 %v1795_v9, %v1443_v34 }
 0x32c   :  { %v1799_v37 = vpop.f32.mrb[7].mxu1 }
 0x32d   :  { %v2230_v47 = vadd.f32 %v1799_v37, %v1443_v34 }
 0x331   :  { %v3081_v6 = vpop.f32.mrb[8].mxu1 }
 0x332   :  { %v3083_v12 = vpop.f32.mrb[9].mxu1  ;;  %v2232_v58 = vadd.f32 %v3081_v6, %v1439_v32 }
 0x333   :  { %v3085_v13 = vpop.f32.mrb[10].mxu1  ;;  %v2234_v59 = vadd.f32 %v3083_v12, %v1443_v34 }
 0x334   :  { %v3087_v33 = vpop.f32.mrb[11].mxu1  ;;  %v2236_v61 = vadd.f32 %v3085_v13, %v1439_v32 }
 0x335   :  { %v2238_v63 = vadd.f32 %v3087_v33, %v1443_v34 }
 0x339   :  { %v3089_v21 = vpop.f32.mrb[12].mxu1 }
 0x33a   :  { %v3091_v51 = vpop.f32.mrb[13].mxu1  ;;  %v2240_v9 = vadd.f32 %v3089_v21, %v1439_v32 }
 0x33b   :  { %v3093_v41 = vpop.f32.mrb[14].mxu1 }
 0x33c   :  { %v3095_v14 = vpop.f32.mrb[15].mxu1  ;;  %v2244_v6 = vadd.f32 %v3093_v41, %v1439_v32 }
 0x33d   :  { %v2246_v33 = vadd.f32 %v3095_v14, %v1443_v34 }
 0x3ad   :  { %v1175_v28 = vpop.f32.mrb[20].mxu0 }
 0x3ae   :  { %v1177_v1 = vpop.f32.mrb[21].mxu0 }
 0x3af   :  { %v1179_v15 = vpop.f32.mrb[22].mxu0 }
 0x3b0   :  { %v1202_v16 = vpack.c.bf16 %v1179_v15, %v1175_v28  ;;  %v1181_v17 = vpop.f32.mrb[23].mxu0 }
 0x3b1   :  { %v1203_v18 = vpack.c.bf16 %v1181_v17, %v1177_v1 }
 0x3b3   :  { %1865 = vmatprep.subr.bf16.mxu0 %v1203_v18  ;;  %2220 = vmatprep.subr.bf16.mxu1 %v1203_v18 }
 0x3b4   :  { %1866 = vmatpush1.bf16.msra.mxu0 %v1202_v16  ;;  %2222 = vmatpush1.bf16.msra.mxu1 %v1202_v16 }
 0x3b5   :  { %v1185_v19 = vpop.f32.mrb[24].mxu0 }
 0x3b6   :  { %v1187_v3 = vpop.f32.mrb[25].mxu0 }
 0x3b7   :  { %v1189_v22 = vpop.f32.mrb[26].mxu0 }
 0x3b8   :  { %v1204_v23 = vpack.c.bf16 %v1189_v22, %v1185_v19  ;;  %v1191_v48 = vpop.f32.mrb[27].mxu0 }
 0x3b9   :  { %v1205_v24 = vpack.c.bf16 %v1191_v48, %v1187_v3 }
 0x3bb   :  { %1867 = vmatprep.subr.bf16.mxu0 %v1205_v24  ;;  %2221 = vmatprep.subr.bf16.mxu1 %v1205_v24 }
 0x3bc   :  { %1868 = vmatpush1.bf16.msra.mxu0 %v1204_v23  ;;  %2223 = vmatpush1.bf16.msra.mxu1 %v1204_v23 }
 0x3bf   :  { %2132 = vmatmul.mubr.msk.bf16.vlgmr.msra.gmra.mrb[28].mxu0 %vm1852_vm1, %v2431_v10  ;;  %2135 = vmatmul.mubr.msk.bf16.vlgmr.msra.gmra.mrb[16].mxu1 %vm1852_vm1, %v2432_v56 }
 0x3c0   :  { %1907 = vmatprep.mubr.bf16.mxu0 %v2657_v0 }
 0x3c7   :  { %2133 = vmatmul.mubr.msk.bf16.gmra.mrb[32].mxu0 %vm1852_vm1, %v2433_v4 }
 0x3c8   :  { %1917 = vmatprep.mubr.bf16.mxu0 %v2657_v0  ;;  %v2228_v0 = vadd.f32 %v1797_v11, %v1439_v32  ;;  %v2242_v11 = vadd.f32 %v3091_v51, %v1443_v34 }
 0x3cf   :  { %2134 = vmatmul.mubr.msk.bf16.gmra.mrb[36].mxu0 %vm1852_vm1, %v2434_v26 }
 0x492   :  { %v1899_v38 = vpop.f32.mrb[28].mxu0  ;;  %v1929_v39 = vpop.f32.mrb[16].mxu1 }
 0x493   :  { %v2225_v42 = vadd.f32 %v2224_v35, %v1899_v38  ;;  %v2248_v43 = vadd.f32 %v1929_v39, %v1439_v32  ;;  %v1901_v44 = vpop.f32.mrb[29].mxu0  ;;  %v1931_v46 = vpop.f32.mrb[17].mxu1 }
 0x494   :  { %v2227_v49 = vadd.f32 %v2226_v36, %v1901_v44  ;;  %v2249_v50 = vadd.f32 %v1931_v46, %v1443_v34  ;;  %v1903_v52 = vpop.f32.mrb[30].mxu0  ;;  %v1933_v20 = vpop.f32.mrb[18].mxu1 }
 0x495   :  { %1938 = vst [vmem:[#allocation16] sm:$0xff] %v2225_v42  ;;  %1950 = vst [vmem:[#allocation16 + $0x60] sm:$0xff] %v2248_v43  ;;  %v2229_v25 = vadd.f32 %v2228_v0, %v1903_v52  ;;  %v2250_v2 = vadd.f32 %v1933_v20, %v1439_v32  ;;  %v1905_v45 = vpop.f32.mrb[31].mxu0  ;;  %v1935_v53 = vpop.f32.mrb[19].mxu1 }
 0x496   :  { %1939 = vst [vmem:[#allocation16 + $0x8] sm:$0xff] %v2227_v49  ;;  %1951 = vst [vmem:[#allocation16 + $0x68] sm:$0xff] %v2249_v50  ;;  %v2231_v55 = vadd.f32 %v2230_v47, %v1905_v45  ;;  %v2251_v57 = vadd.f32 %v1935_v53, %v1443_v34 }
 0x497   :  { %1940 = vst [vmem:[#allocation16 + $0x10] sm:$0xff] %v2229_v25  ;;  %1952 = vst [vmem:[#allocation16 + $0x70] sm:$0xff] %v2250_v2 }
 0x498   :  { %1941 = vst [vmem:[#allocation16 + $0x18] sm:$0xff] %v2231_v55  ;;  %1953 = vst [vmem:[#allocation16 + $0x78] sm:$0xff] %v2251_v57 }
 0x49a   :  { %v1909_v60 = vpop.f32.mrb[32].mxu0 }
 0x49b   :  { %v2233_v62 = vadd.f32 %v2232_v58, %v1909_v60  ;;  %v1911_v40 = vpop.f32.mrb[33].mxu0 }
 0x49c   :  { %v2235_v29 = vadd.f32 %v2234_v59, %v1911_v40  ;;  %v1913_v5 = vpop.f32.mrb[34].mxu0 }
 0x49d   :  { %1942 = vst [vmem:[#allocation16 + $0x20] sm:$0xff] %v2233_v62  ;;  %v2237_v7 = vadd.f32 %v2236_v61, %v1913_v5  ;;  %v1915_v54 = vpop.f32.mrb[35].mxu0 }
 0x49e   :  { %1943 = vst [vmem:[#allocation16 + $0x28] sm:$0xff] %v2235_v29  ;;  %v2239_v8 = vadd.f32 %v2238_v63, %v1915_v54 }
 0x49f   :  { %1944 = vst [vmem:[#allocation16 + $0x30] sm:$0xff] %v2237_v7 }
 0x4a0   :  { %1945 = vst [vmem:[#allocation16 + $0x38] sm:$0xff] %v2239_v8 }
 0x4a2   :  { %v1919_v37 = vpop.f32.mrb[36].mxu0 }
 0x4a3   :  { %v2241_v12 = vadd.f32 %v2240_v9, %v1919_v37  ;;  %v1921_v13 = vpop.f32.mrb[37].mxu0 }
 0x4a4   :  { %v2243_v28 = vadd.f32 %v2242_v11, %v1921_v13  ;;  %v1923_v1 = vpop.f32.mrb[38].mxu0 }
 0x4a5   :  { %1946 = vst [vmem:[#allocation16 + $0x40] sm:$0xff] %v2241_v12  ;;  %v2245_v15 = vadd.f32 %v2244_v6, %v1923_v1  ;;  %v1925_v16 = vpop.f32.mrb[39].mxu0 }
 0x4a6   :  { %1947 = vst [vmem:[#allocation16 + $0x48] sm:$0xff] %v2243_v28  ;;  %v2247_v17 = vadd.f32 %v2246_v33, %v1925_v16 }
 0x4a7   :  { %1948 = vst [vmem:[#allocation16 + $0x50] sm:$0xff] %v2245_v15 }
 0x4a8   :  { %1949 = vst [vmem:[#allocation16 + $0x58] sm:$0xff] %v2247_v17 }
 0x4a9   :  { %2622 = shalt.err (!%p2619_p12)
}
 0x4aa   :  { %s2623_s15 = scalar_lea.hbm %s3148_s12, 2048 }
 0x4ab   :  { %p2624_p13 = scmp.ne.s32.totalorder %s3148_s12, %s2623_s15  ;;  %p2627_p0 = scmp.lt.u32.totalorder %s2623_s15, %s3148_s12 }
 0x4ad   :  { %p2629_p1 = pnand %p2627_p0, %p2624_p13 }
 0x4af   :  { %2632 = shalt.err (!%p2629_p1)
}
 0x4b0   :  { %s2660_s0 = smov 256   ;;  %s2661_s16 = smov 16  }
 0x4b1   :  { %1965 = dma.vmem_to_hbm [thread:$0]  %s1960_s10, 2048, %s3148_s12, [#allocation4], %s2660_s0, %s2660_s0, %s2661_s16  }
 0x4b2   :  { %2643 = dma.done.wait [#allocation4], 2048  }
 0x4b3   :  { %2644 = vsyncadd [#allocation4], 4294965248 }
 0x4b4   :  { %1969 = vsyncpa [#allocation3], 1 }
 0x4b5   :  { %1970 = vsyncpa [#allocation6], 1 }
 0x4b6   :  { %1971 = vsyncpa [#allocation9], 1 }
 0x4b7   :  { %1972 = vsyncpa [#allocation12], 1 }
 0x4b8   :  { %1973 = vsyncpa [#allocation15], 1 }
 0x4b9   :  { %1974 = vsyncpa [#allocation4], 1 }

</bundles_post_ra>
